<compile_context>
chip_gen: v5e
topology: v5e:2x2
jax: 0.10.0
libtpu: 0.0.40
codegen_flags: <defaults>
</compile_context>

<pallas_src>
from functools import partial

import jax
import jax.numpy as jnp
from jax.experimental import pallas as pl
from jax.experimental.pallas import tpu as pltpu


_LOG_CLAMP = -100.0  # torch.nn.functional.binary_cross_entropy clamps log at -100


def _clamped_log(x):
    return jnp.maximum(jnp.log(x), _LOG_CLAMP)


def _round_up(x, m):
    return -(-x // m) * m


def _bce_elem_sum(s, y, binary_labels):
    """Sum over all elements of BCE(pred=s, target=y)."""
    if binary_labels:
        # labels in {0,1}: a single clamped log per element (half the EUP work)
        return -jnp.sum(_clamped_log(jnp.where(y > 0.5, s, 1.0 - s)))
    # exact soft-label form (matches F.binary_cross_entropy for any target)
    return -jnp.sum(y * _clamped_log(s) + (1.0 - y) * _clamped_log(1.0 - s))


def _store_partials(out_ref, unary_sum, recall_sum, spec_sum, prec_sum):
    """One dense (1, 8, 128) store: sublane k holds partial sum k (lane-bcast)."""
    row = jax.lax.broadcasted_iota(jnp.int32, (8, 128), 0)
    blk = jnp.where(row == 0, unary_sum,
          jnp.where(row == 1, recall_sum,
          jnp.where(row == 2, spec_sum,
          jnp.where(row == 3, prec_sum, 0.0))))
    out_ref[...] = blk[None].astype(jnp.float32)


# --------------------------------------------------------------------------
# Primary kernel: lane-dense [TB, N*N] slabs, row reductions on the MXU.
# --------------------------------------------------------------------------
def _affinity_kernel_flat(score_ref, label_ref, sel_ref, out_ref, *,
                          n_cls, binary_labels):
    s = score_ref[...].astype(jnp.float32)        # (TB, N*N), lane-dense
    y = label_ref[...].astype(jnp.float32)        # (TB, N*N)
    sel = sel_ref[...]                            # (N*N, 2N): [rowsum | offdiag rowsum]

    # ---- unary BCE: full-lane-density elementwise + EUP log ----
    unary_sum = _bce_elem_sum(s, y, binary_labels)

    # ---- per-row reductions as small matmuls on the (otherwise idle) MXU ----
    one_m_y = 1.0 - y

    def rowsums(a):                               # (TB, N*N) @ (N*N, 2N) -> (TB, 2N)
        return jnp.dot(a, sel, preferred_element_type=jnp.float32)

    rs = rowsums(s)[:, :n_cls]                    # rowsum(s)             precision denom
    vnum = rowsums(s * y)[:, n_cls:]              # rowsum(s*y*offd)      recall/prec num
    vden = rowsums(y)[:, n_cls:]                  # rowsum(y*offd)        recall denom
    snum = rowsums((1.0 - s) * one_m_y)[:, :n_cls]  # rowsum((1-s)(1-y))  spec num (direct)
    sden = rowsums(one_m_y)[:, :n_cls]            # rowsum(1-y)           spec denom (direct)

    recall = vnum / jnp.where(vden > 0.0, vden, 1.0)
    spec = snum / jnp.where(sden > 0.0, sden, 1.0)
    prec = vnum / jnp.where(rs > 0.0, rs, 1.0)

    recall_sum = -jnp.sum(_clamped_log(recall))
    spec_sum = -jnp.sum(_clamped_log(spec))
    prec_sum = -jnp.sum(_clamped_log(prec))

    _store_partials(out_ref, unary_sum, recall_sum, spec_sum, prec_sum)


# --------------------------------------------------------------------------
# Fallback kernel for large N (selection matrix too big): [TB, N, N] layout.
# --------------------------------------------------------------------------
def _affinity_kernel_3d(score_ref, label_ref, offd_ref, out_ref, *,
                        binary_labels):
    s = score_ref[...].astype(jnp.float32)        # (TB, N, N)
    y = label_ref[...].astype(jnp.float32)
    offd = offd_ref[...]                          # (N, N) = 1 - eye(N)

    unary_sum = _bce_elem_sum(s, y, binary_labels)

    one_m_y = 1.0 - y
    rs = jnp.sum(s, axis=-1)                      # (TB, N)
    vnum = jnp.sum(s * y * offd, axis=-1)
    vden = jnp.sum(y * offd, axis=-1)
    snum = jnp.sum((1.0 - s) * one_m_y, axis=-1)  # direct: no cancellation
    sden = jnp.sum(one_m_y, axis=-1)

    recall = vnum / jnp.where(vden > 0.0, vden, 1.0)
    spec = snum / jnp.where(sden > 0.0, sden, 1.0)
    prec = vnum / jnp.where(rs > 0.0, rs, 1.0)

    recall_sum = -jnp.sum(_clamped_log(recall))
    spec_sum = -jnp.sum(_clamped_log(spec))
    prec_sum = -jnp.sum(_clamped_log(prec))

    _store_partials(out_ref, unary_sum, recall_sum, spec_sum, prec_sum)


# --------------------------------------------------------------------------
# Tiling helpers
# --------------------------------------------------------------------------
def _tpu_defaults():
    """(vmem_limit_bytes, prefer_multi_step) per TPU generation."""
    try:
        kind = jax.devices()[0].device_kind.lower()
    except Exception:
        kind = ""
    if "7" in kind:
        # v7x: 64 MiB physical VMEM (32 MiB scoped default), 2 TensorCores.
        return 48 * 1024 * 1024, True
    if "v6" in kind or "v5e" in kind or "v5 lite" in kind or "v5lite" in kind:
        # v5e / v6e: 128 MiB VMEM, single TensorCore -> biggest tile that fits.
        return 64 * 1024 * 1024, False
    if "v4" in kind or "v5p" in kind:
        # megacore parts: keep >= 2 parallel grid steps so both cores get work.
        return 48 * 1024 * 1024, True
    return 32 * 1024 * 1024, False


def _pick_batch_tile(B, est_bytes, budget, prefer_multi_step, need_mult8):
    """Largest divisor of B whose padded footprint fits the VMEM budget.

    need_mult8: the flat layout's block second-minor dim must be a multiple
    of 8 (or the full batch) to satisfy the TPU (8, 128) block constraint.
    If prefer_multi_step, favor tiles giving >= 2 grid steps (multi-TC parts).
    """
    def legal(tb):
        return B % tb == 0 and (not need_mult8 or tb % 8 == 0 or tb == B)

    cands = [tb for tb in range(1, B + 1) if legal(tb) and est_bytes(tb) <= budget]
    if not cands:
        # Nothing fits the budget: smallest legal tile, rely on vmem headroom.
        return min(tb for tb in range(1, B + 1) if legal(tb))
    if prefer_multi_step and B > 1:
        multi = [tb for tb in cands if B // tb >= 2]
        if multi:
            return max(multi)
    return max(cands)


def _build_selection_matrix(n_cls):
    """(N*N, 2N) f32. Column c sums row c of the flattened (N, N) matrix;
    column N+c does the same but excludes the diagonal element (c, c)."""
    row_i = jnp.repeat(jnp.arange(n_cls), n_cls)   # i of flat index i*N + j
    row_j = jnp.tile(jnp.arange(n_cls), n_cls)     # j of flat index i*N + j
    col = jnp.arange(n_cls)
    sel_all = (row_i[:, None] == col[None, :]).astype(jnp.float32)
    sel_off = sel_all * (row_j[:, None] != col[None, :]).astype(jnp.float32)
    return jnp.concatenate([sel_all, sel_off], axis=1)


# --------------------------------------------------------------------------
# Wrapper
# --------------------------------------------------------------------------
def affinity_loss(cls_score, label, *, loss_weight=1.0, binary_labels=True,
                  prefer_multi_step=None, vmem_limit_bytes=None,
                  force_3d=False, sel_budget_bytes=4 * 1024 * 1024):
    """AffinityLoss forward (reduction='mean') for [B, N, N] inputs."""
    B, N, N2 = cls_score.shape
    assert N == N2 and label.shape == cls_score.shape
    NN = N * N

    gen_vmem, gen_multi = _tpu_defaults()
    if vmem_limit_bytes is None:
        vmem_limit_bytes = gen_vmem
    if prefer_multi_step is None:
        prefer_multi_step = gen_multi
    budget = (vmem_limit_bytes * 3) // 4          # headroom for compiler scratch

    in_item = jnp.dtype(cls_score.dtype).itemsize
    sel_bytes = _round_up(NN, 8) * _round_up(2 * N, 128) * 4
    use_flat = (not force_3d) and (sel_bytes <= sel_budget_bytes)
    n_log_per_elem = 1 if binary_labels else 2

    if use_flat:
        # ---------- lane-dense flat path ----------
        s2d = cls_score.reshape(B, NN)
        y2d = label.reshape(B, NN)
        nn_pad = _round_up(NN, 128)

        def est_bytes(tb):
            tb_pad = _round_up(tb, 8)
            in_bytes = tb_pad * nn_pad * in_item          # one input buffer
            f32_bytes = tb_pad * nn_pad * 4               # one live f32 temp
            return 2 * 2 * in_bytes + 6 * f32_bytes + 2 * sel_bytes

        tb = _pick_batch_tile(B, est_bytes, budget, prefer_multi_step,
                              need_mult8=True)
        num_steps = B // tb

        sel = _build_selection_matrix(N)                  # (NN, 2N) f32, DMA'd once
        kernel = partial(_affinity_kernel_flat, n_cls=N,
                         binary_labels=binary_labels)
        cost = pl.CostEstimate(
            flops=int(8 * B * NN + 2 * 5 * B * NN * 2 * N),
            transcendentals=int(n_log_per_elem * B * NN + 3 * B * N),
            bytes_accessed=int(2 * B * NN * in_item + sel_bytes
                               + num_steps * 8 * 128 * 4))

        partials = pl.pallas_call(
            kernel,
            out_shape=jax.ShapeDtypeStruct((num_steps, 8, 128), jnp.float32),
            grid_spec=pltpu.PrefetchScalarGridSpec(
                num_scalar_prefetch=0,
                grid=(num_steps,),
                in_specs=[
                    pl.BlockSpec((tb, NN), lambda i: (i, 0)),
                    pl.BlockSpec((tb, NN), lambda i: (i, 0)),
                    pl.BlockSpec((NN, 2 * N), lambda i: (0, 0)),   # constant block
                ],
                out_specs=pl.BlockSpec((1, 8, 128), lambda i: (i, 0, 0)),
            ),
            compiler_params=pltpu.CompilerParams(
                dimension_semantics=("parallel",),
                vmem_limit_bytes=vmem_limit_bytes,
            ),
            cost_estimate=cost,
        )(s2d, y2d, sel)
    else:
        # ---------- 3-D fallback (large N: selection matrix too big) ----------
        per_sample_pad = _round_up(N, 8) * _round_up(N, 128)
        offd_bytes = per_sample_pad * 4

        def est_bytes(tb):
            in_bytes = tb * per_sample_pad * in_item
            f32_bytes = tb * per_sample_pad * 4
            return 2 * 2 * in_bytes + 6 * f32_bytes + 2 * offd_bytes

        tb = _pick_batch_tile(B, est_bytes, budget, prefer_multi_step,
                              need_mult8=False)
        num_steps = B // tb

        offd = 1.0 - jnp.eye(N, dtype=jnp.float32)        # constant, DMA'd once
        kernel = partial(_affinity_kernel_3d, binary_labels=binary_labels)
        cost = pl.CostEstimate(
            flops=int(14 * B * NN),
            transcendentals=int(n_log_per_elem * B * NN + 3 * B * N),
            bytes_accessed=int(2 * B * NN * in_item + N * N * 4
                               + num_steps * 8 * 128 * 4))

        partials = pl.pallas_call(
            kernel,
            out_shape=jax.ShapeDtypeStruct((num_steps, 8, 128), jnp.float32),
            grid_spec=pltpu.PrefetchScalarGridSpec(
                num_scalar_prefetch=0,
                grid=(num_steps,),
                in_specs=[
                    pl.BlockSpec((tb, N, N), lambda i: (i, 0, 0)),
                    pl.BlockSpec((tb, N, N), lambda i: (i, 0, 0)),
                    pl.BlockSpec((N, N), lambda i: (0, 0)),
                ],
                out_specs=pl.BlockSpec((1, 8, 128), lambda i: (i, 0, 0)),
            ),
            compiler_params=pltpu.CompilerParams(
                dimension_semantics=("parallel",),
                vmem_limit_bytes=vmem_limit_bytes,
            ),
            cost_estimate=cost,
        )(cls_score, label, offd)

    # Tiny final reduction in f32 in the wrapper.
    sums = jnp.sum(partials[:, :4, 0].astype(jnp.float32), axis=0)   # (4,)
    unary_mean = sums[0] / jnp.float32(B * NN)
    global_mean = (sums[1] + sums[2] + sums[3]) / jnp.float32(B * N)
    # TODO(synk): reduction_override ('none'/'sum'), per-element weight and
    # avg_factor of the PyTorch module are not implemented ('mean' path only).
    return loss_weight * (unary_mean + global_mean)


# --------------------------------------------------------------------------
# Pure-JAX reference mirroring the PyTorch forward (reduction='mean').
# --------------------------------------------------------------------------
def affinity_loss_ref(s, y, *, loss_weight=1.0):
    s = s.astype(jnp.float32)
    y = y.astype(jnp.float32)
    N = y.shape[1]
    eye = jnp.eye(N, dtype=jnp.float32)
    vtarget = (1.0 - eye)[None] * y
    clog = lambda x: jnp.maximum(jnp.log(x), -100.0)

    unary = jnp.mean(-(y * clog(s) + (1.0 - y) * clog(1.0 - s)))

    num = jnp.sum(s * vtarget, axis=2)
    den = jnp.sum(vtarget, axis=2)
    recall = jnp.mean(-clog(num / jnp.where(den > 0, den, 1.0)))

    snum = jnp.sum((1.0 - s) * (1.0 - y), axis=2)
    sden = jnp.sum(1.0 - y, axis=2)
    spec = jnp.mean(-clog(snum / jnp.where(sden > 0, sden, 1.0)))

    pden = jnp.sum(s, axis=2)
    prec = jnp.mean(-clog(num / jnp.where(pden > 0, pden, 1.0)))

    return loss_weight * (unary + recall + spec + prec)


if __name__ == "__main__":
    key = jax.random.PRNGKey(0)
    ks = jax.random.split(key, 6)
    N = 32
    TOL = dict(rtol=2e-3, atol=2e-3)   # MXU rowsums may use reduced-precision passes

    # 1) Canonical small case: B=2, binary labels, flat lane-dense path.
    B = 2
    s1 = jax.random.uniform(ks[0], (B, N, N), jnp.float32, minval=0.05, maxval=0.95)
    y1 = (jax.random.uniform(ks[1], (B, N, N), jnp.float32) < 0.3).astype(jnp.float32)
    out1 = jax.block_until_ready(affinity_loss(s1, y1, loss_weight=1.0))
    ref1 = affinity_loss_ref(s1, y1, loss_weight=1.0)
    assert jnp.allclose(out1, ref1, **TOL), (out1, ref1)

    # 2) Multi-step case: B=16 with prefer_multi_step -> two (TB=8) grid steps
    #    (exercises the "parallel" batch axis / multi-TensorCore split).
    B2 = 16
    s2 = jax.random.uniform(ks[2], (B2, N, N), jnp.float32, minval=0.05, maxval=0.95)
    y2 = (jax.random.uniform(ks[3], (B2, N, N), jnp.float32) < 0.3).astype(jnp.float32)
    out2 = jax.block_until_ready(affinity_loss(s2, y2, prefer_multi_step=True))
    ref2 = affinity_loss_ref(s2, y2)
    assert jnp.allclose(out2, ref2, **TOL), (out2, ref2)

    # 3) Soft labels through the exact two-log unary path (flat kernel).
    B3 = 4
    s3 = jax.random.uniform(ks[4], (B3, N, N), jnp.float32, minval=0.05, maxval=0.95)
    y3 = jax.random.uniform(ks[5], (B3, N, N), jnp.float32, minval=0.0, maxval=1.0)
    out3 = jax.block_until_ready(affinity_loss(s3, y3, binary_labels=False))
    ref3 = affinity_loss_ref(s3, y3)
    assert jnp.allclose(out3, ref3, **TOL), (out3, ref3)

    # 4) Large-N fallback kernel (forced at small N so it is exercised here).
    out4 = jax.block_until_ready(affinity_loss(s1, y1, force_3d=True))
    assert jnp.allclose(out4, ref1, **TOL), (out4, ref1)

    print("KERNEL_OK")
</pallas_src>

<mosaic_0001>
module attributes {stable_mosaic.version = 11 : i64} {
  func.func @_affinity_kernel_flat(%arg0: i32, %arg1: memref<2x1024xf32, #tpu.memory_space<vmem>>, %arg2: memref<2x1024xf32, #tpu.memory_space<vmem>>, %arg3: memref<1024x64xf32, #tpu.memory_space<vmem>>, %arg4: memref<1x8x128xf32, #tpu.memory_space<vmem>>) attributes {dimension_semantics = [#tpu.dimension_semantics<parallel>], iteration_bounds = array<i64: 1>, scalar_prefetch = 0 : i64, scratch_operands = 0 : i64, tpu.core_type = #tpu.core_type<tc>, window_params = [{transform_indices = @transform_0, window_bounds = array<i64: 2, 1024>}, {transform_indices = @transform_1, window_bounds = array<i64: 2, 1024>}, {pipeline_mode = #tpu.pipeline_mode<synchronous>, transform_indices = @transform_2, window_bounds = array<i64: 1024, 64>}, {transform_indices = @transform_3, window_bounds = array<i64: 1, 8, 128>}]} {
    %c0 = arith.constant 0 : index
    %c0_0 = arith.constant 0 : index
    %0 = vector.load %arg1[%c0, %c0_0] : memref<2x1024xf32, #tpu.memory_space<vmem>>, vector<2x1024xf32>
    %c0_1 = arith.constant 0 : index
    %c0_2 = arith.constant 0 : index
    %1 = vector.load %arg2[%c0_1, %c0_2] : memref<2x1024xf32, #tpu.memory_space<vmem>>, vector<2x1024xf32>
    %c0_3 = arith.constant 0 : index
    %c0_4 = arith.constant 0 : index
    %2 = vector.load %arg3[%c0_3, %c0_4] : memref<1024x64xf32, #tpu.memory_space<vmem>>, vector<1024x64xf32>
    %cst = arith.constant 5.000000e-01 : f32
    %3 = vector.broadcast %cst : f32 to vector<2x1024xf32>
    %4 = arith.cmpf ogt, %1, %3 : vector<2x1024xf32>
    %cst_5 = arith.constant 1.000000e+00 : f32
    %5 = vector.broadcast %cst_5 : f32 to vector<2x1024xf32>
    %6 = arith.subf %5, %0 : vector<2x1024xf32>
    %7 = arith.select %4, %0, %6 : vector<2x1024xi1>, vector<2x1024xf32>
    %8 = math.log %7 : vector<2x1024xf32>
    %cst_6 = arith.constant -1.000000e+02 : f32
    %9 = vector.broadcast %cst_6 : f32 to vector<2x1024xf32>
    %10 = arith.maximumf %8, %9 : vector<2x1024xf32>
    %11 = vector.shape_cast %10 : vector<2x1024xf32> to vector<1x2x1024xf32>
    %cst_7 = arith.constant dense<0.000000e+00> : vector<1xf32>
    %12 = vector.multi_reduction <add>, %11, %cst_7 [1, 2] : vector<1x2x1024xf32> to vector<1xf32>
    %13 = vector.shape_cast %12 : vector<1xf32> to vector<1x1x1xf32>
    %14 = vector.extract %13[0, 0, 0] : f32 from vector<1x1x1xf32>
    %cst_8 = arith.constant 0.000000e+00 : f32
    %15 = arith.subf %cst_8, %14 : f32
    %cst_9 = arith.constant 1.000000e+00 : f32
    %16 = vector.broadcast %cst_9 : f32 to vector<2x1024xf32>
    %17 = arith.subf %16, %1 : vector<2x1024xf32>
    %cst_10 = arith.constant dense<0.000000e+00> : vector<2x64xf32>
    %18 = tpu.matmul %0, %2, %cst_10 {dimension_numbers = #tpu.dot_dimension_numbers<[1], [0], [0], [1], [0, 0, 1, 1], [], []>} : vector<2x1024xf32>, vector<1024x64xf32>, vector<2x64xf32> -> vector<2x64xf32>
    %19 = vector.extract_strided_slice %18 {offsets = [0, 0], sizes = [2, 32], strides = [1, 1]} : vector<2x64xf32> to vector<2x32xf32>
    %20 = arith.mulf %0, %1 : vector<2x1024xf32>
    %cst_11 = arith.constant dense<0.000000e+00> : vector<2x64xf32>
    %21 = tpu.matmul %20, %2, %cst_11 {dimension_numbers = #tpu.dot_dimension_numbers<[1], [0], [0], [1], [0, 0, 1, 1], [], []>} : vector<2x1024xf32>, vector<1024x64xf32>, vector<2x64xf32> -> vector<2x64xf32>
    %22 = vector.extract_strided_slice %21 {offsets = [0, 32], sizes = [2, 32], strides = [1, 1]} : vector<2x64xf32> to vector<2x32xf32>
    %cst_12 = arith.constant dense<0.000000e+00> : vector<2x64xf32>
    %23 = tpu.matmul %1, %2, %cst_12 {dimension_numbers = #tpu.dot_dimension_numbers<[1], [0], [0], [1], [0, 0, 1, 1], [], []>} : vector<2x1024xf32>, vector<1024x64xf32>, vector<2x64xf32> -> vector<2x64xf32>
    %24 = vector.extract_strided_slice %23 {offsets = [0, 32], sizes = [2, 32], strides = [1, 1]} : vector<2x64xf32> to vector<2x32xf32>
    %cst_13 = arith.constant 1.000000e+00 : f32
    %25 = vector.broadcast %cst_13 : f32 to vector<2x1024xf32>
    %26 = arith.subf %25, %0 : vector<2x1024xf32>
    %27 = arith.mulf %26, %17 : vector<2x1024xf32>
    %cst_14 = arith.constant dense<0.000000e+00> : vector<2x64xf32>
    %28 = tpu.matmul %27, %2, %cst_14 {dimension_numbers = #tpu.dot_dimension_numbers<[1], [0], [0], [1], [0, 0, 1, 1], [], []>} : vector<2x1024xf32>, vector<1024x64xf32>, vector<2x64xf32> -> vector<2x64xf32>
    %29 = vector.extract_strided_slice %28 {offsets = [0, 0], sizes = [2, 32], strides = [1, 1]} : vector<2x64xf32> to vector<2x32xf32>
    %cst_15 = arith.constant dense<0.000000e+00> : vector<2x64xf32>
    %30 = tpu.matmul %17, %2, %cst_15 {dimension_numbers = #tpu.dot_dimension_numbers<[1], [0], [0], [1], [0, 0, 1, 1], [], []>} : vector<2x1024xf32>, vector<1024x64xf32>, vector<2x64xf32> -> vector<2x64xf32>
    %31 = vector.extract_strided_slice %30 {offsets = [0, 0], sizes = [2, 32], strides = [1, 1]} : vector<2x64xf32> to vector<2x32xf32>
    %cst_16 = arith.constant 0.000000e+00 : f32
    %32 = vector.broadcast %cst_16 : f32 to vector<2x32xf32>
    %33 = arith.cmpf ogt, %24, %32 : vector<2x32xf32>
    %cst_17 = arith.constant 1.000000e+00 : f32
    %34 = vector.broadcast %cst_17 : f32 to vector<2x32xf32>
    %35 = arith.select %33, %24, %34 : vector<2x32xi1>, vector<2x32xf32>
    %36 = arith.divf %22, %35 : vector<2x32xf32>
    %cst_18 = arith.constant 0.000000e+00 : f32
    %37 = vector.broadcast %cst_18 : f32 to vector<2x32xf32>
    %38 = arith.cmpf ogt, %31, %37 : vector<2x32xf32>
    %cst_19 = arith.constant 1.000000e+00 : f32
    %39 = vector.broadcast %cst_19 : f32 to vector<2x32xf32>
    %40 = arith.select %38, %31, %39 : vector<2x32xi1>, vector<2x32xf32>
    %41 = arith.divf %29, %40 : vector<2x32xf32>
    %cst_20 = arith.constant 0.000000e+00 : f32
    %42 = vector.broadcast %cst_20 : f32 to vector<2x32xf32>
    %43 = arith.cmpf ogt, %19, %42 : vector<2x32xf32>
    %cst_21 = arith.constant 1.000000e+00 : f32
    %44 = vector.broadcast %cst_21 : f32 to vector<2x32xf32>
    %45 = arith.select %43, %19, %44 : vector<2x32xi1>, vector<2x32xf32>
    %46 = arith.divf %22, %45 : vector<2x32xf32>
    %47 = math.log %36 : vector<2x32xf32>
    %cst_22 = arith.constant -1.000000e+02 : f32
    %48 = vector.broadcast %cst_22 : f32 to vector<2x32xf32>
    %49 = arith.maximumf %47, %48 : vector<2x32xf32>
    %50 = vector.shape_cast %49 : vector<2x32xf32> to vector<1x2x32xf32>
    %cst_23 = arith.constant dense<0.000000e+00> : vector<1xf32>
    %51 = vector.multi_reduction <add>, %50, %cst_23 [1, 2] : vector<1x2x32xf32> to vector<1xf32>
    %52 = vector.shape_cast %51 : vector<1xf32> to vector<1x1x1xf32>
    %53 = vector.extract %52[0, 0, 0] : f32 from vector<1x1x1xf32>
    %cst_24 = arith.constant 0.000000e+00 : f32
    %54 = arith.subf %cst_24, %53 : f32
    %55 = math.log %41 : vector<2x32xf32>
    %cst_25 = arith.constant -1.000000e+02 : f32
    %56 = vector.broadcast %cst_25 : f32 to vector<2x32xf32>
    %57 = arith.maximumf %55, %56 : vector<2x32xf32>
    %58 = vector.shape_cast %57 : vector<2x32xf32> to vector<1x2x32xf32>
    %cst_26 = arith.constant dense<0.000000e+00> : vector<1xf32>
    %59 = vector.multi_reduction <add>, %58, %cst_26 [1, 2] : vector<1x2x32xf32> to vector<1xf32>
    %60 = vector.shape_cast %59 : vector<1xf32> to vector<1x1x1xf32>
    %61 = vector.extract %60[0, 0, 0] : f32 from vector<1x1x1xf32>
    %cst_27 = arith.constant 0.000000e+00 : f32
    %62 = arith.subf %cst_27, %61 : f32
    %63 = math.log %46 : vector<2x32xf32>
    %cst_28 = arith.constant -1.000000e+02 : f32
    %64 = vector.broadcast %cst_28 : f32 to vector<2x32xf32>
    %65 = arith.maximumf %63, %64 : vector<2x32xf32>
    %66 = vector.shape_cast %65 : vector<2x32xf32> to vector<1x2x32xf32>
    %cst_29 = arith.constant dense<0.000000e+00> : vector<1xf32>
    %67 = vector.multi_reduction <add>, %66, %cst_29 [1, 2] : vector<1x2x32xf32> to vector<1xf32>
    %68 = vector.shape_cast %67 : vector<1xf32> to vector<1x1x1xf32>
    %69 = vector.extract %68[0, 0, 0] : f32 from vector<1x1x1xf32>
    %cst_30 = arith.constant 0.000000e+00 : f32
    %70 = arith.subf %cst_30, %69 : f32
    %71 = tpu.iota {dimensions = array<i32: 0>} : vector<8x128xi32>
    %c0_i32 = arith.constant 0 : i32
    %72 = vector.broadcast %c0_i32 : i32 to vector<8x128xi32>
    %73 = arith.cmpi eq, %71, %72 : vector<8x128xi32>
    %c1_i32 = arith.constant 1 : i32
    %74 = vector.broadcast %c1_i32 : i32 to vector<8x128xi32>
    %75 = arith.cmpi eq, %71, %74 : vector<8x128xi32>
    %c2_i32 = arith.constant 2 : i32
    %76 = vector.broadcast %c2_i32 : i32 to vector<8x128xi32>
    %77 = arith.cmpi eq, %71, %76 : vector<8x128xi32>
    %c3_i32 = arith.constant 3 : i32
    %78 = vector.broadcast %c3_i32 : i32 to vector<8x128xi32>
    %79 = arith.cmpi eq, %71, %78 : vector<8x128xi32>
    %cst_31 = arith.constant 0.000000e+00 : f32
    %80 = vector.broadcast %70 : f32 to vector<8x128xf32>
    %81 = vector.broadcast %cst_31 : f32 to vector<8x128xf32>
    %82 = arith.select %79, %80, %81 : vector<8x128xi1>, vector<8x128xf32>
    %83 = vector.broadcast %62 : f32 to vector<8x128xf32>
    %84 = arith.select %77, %83, %82 : vector<8x128xi1>, vector<8x128xf32>
    %85 = vector.broadcast %54 : f32 to vector<8x128xf32>
    %86 = arith.select %75, %85, %84 : vector<8x128xi1>, vector<8x128xf32>
    %87 = vector.broadcast %15 : f32 to vector<8x128xf32>
    %88 = arith.select %73, %87, %86 : vector<8x128xi1>, vector<8x128xf32>
    %89 = vector.shape_cast %88 : vector<8x128xf32> to vector<1x8x128xf32>
    %c0_32 = arith.constant 0 : index
    %c0_33 = arith.constant 0 : index
    %c0_34 = arith.constant 0 : index
    %90 = vector.load %arg4[%c0_32, %c0_33, %c0_34] : memref<1x8x128xf32, #tpu.memory_space<vmem>>, vector<1x8x128xf32>
    tpu.vector_store %arg4[%c0_32, %c0_33, %c0_34], %89 {strides = array<i32>} : memref<1x8x128xf32, #tpu.memory_space<vmem>>, vector<1x8x128xf32>,
    return
  }
  func.func @transform_0(%arg0: i32) -> (i32, i32) {
    %c0_i32 = arith.constant 0 : i32
    %c0_i32_0 = arith.constant 0 : i32
    return %arg0, %c0_i32 : i32, i32
  }
  func.func @transform_1(%arg0: i32) -> (i32, i32) {
    %c0_i32 = arith.constant 0 : i32
    %c0_i32_0 = arith.constant 0 : i32
    return %arg0, %c0_i32 : i32, i32
  }
  func.func @transform_2(%arg0: i32) -> (i32, i32) {
    %c0_i32 = arith.constant 0 : i32
    %c0_i32_0 = arith.constant 0 : i32
    %c0_i32_1 = arith.constant 0 : i32
    return %c0_i32, %c0_i32_0 : i32, i32
  }
  func.func @transform_3(%arg0: i32) -> (i32, i32, i32) {
    %c0_i32 = arith.constant 0 : i32
    %c0_i32_0 = arith.constant 0 : i32
    %c0_i32_1 = arith.constant 0 : i32
    return %arg0, %c0_i32, %c0_i32_0 : i32, i32, i32
  }
}

</mosaic_0001>

<bundles_post_ra>
// kernel: tpu_custom_call.1
= control target key start
LH: loop header
LB: loop body
LE: loop exit
PB: predicated region body
PF: predicated region fallthrough
CT: control target
= control target key end

     0   :  { %s3495_s0 = inlined_call_operand.vmem [shape: f32[2,1024], index: 0, kind: input, shape index: {}]   ;;  %s3496_s1 = inlined_call_operand.vmem [shape: f32[2,1024], index: 1, kind: input, shape index: {}]   ;;  %s3497_s2 = inlined_call_operand.vmem [shape: f32[1024,64], index: 2, kind: input, shape index: {}]   ;;  %s3498_s3 = inlined_call_operand.hbm [shape: f32[1,8,128], index: 3, kind: output, shape index: {}]  }
   0x1   :  { %v1461_v0 = vld [vmem:[%s3497_s2 + $0x78] sm:$0xff]  ;;  %v1471_v2 = vld [vmem:[%s3497_s2 + $0x70] sm:$0xff]  ;;  %v1495_v6 = vld [vmem:[%s3497_s2 + $0x68] sm:$0xff] }
   0x2   :  { %v1466_v1 = vld [vmem:[%s3497_s2 + $0x178] sm:$0xff]  ;;  %229 = vmatpush.msra.mxu0 %v1461_v0  ;;  %v1483_v4 = vld [vmem:[%s3497_s2 + $0x170] sm:$0xff]  ;;  %v1505_v8 = vld [vmem:[%s3497_s2 + $0x168] sm:$0xff] }
   0x3   :  { %269 = vmatpush.msra.mxu2 %v1466_v1  ;;  %v1478_v3 = vld [vmem:[%s3497_s2 + $0xf8] sm:$0xff]  ;;  %v1500_v7 = vld [vmem:[%s3497_s2 + $0xf0] sm:$0xff]  ;;  %v1517_v10 = vld [vmem:[%s3497_s2 + $0xe8] sm:$0xff] }
   0x4   :  { %v1488_v5 = vld [vmem:[%s3497_s2 + $0x1f8] sm:$0xff]  ;;  %249 = vmatpush.msra.mxu1 %v1478_v3  ;;  %230 = vmatpush.msra.mxu0 %v1471_v2  ;;  %v1512_v9 = vld [vmem:[%s3497_s2 + $0x1f0] sm:$0xff]  ;;  %v1524_v11 = vld [vmem:[%s3497_s2 + $0x60] sm:$0xff] }
   0x5   :  { %289 = vmatpush.msra.mxu3 %v1488_v5  ;;  %270 = vmatpush.msra.mxu2 %v1483_v4  ;;  %v1529_v12 = vld [vmem:[%s3497_s2 + $0x160] sm:$0xff]  ;;  %v1534_v13 = vld [vmem:[%s3497_s2 + $0x1e8] sm:$0xff]  ;;  %v1553_v16 = vld [vmem:[%s3497_s2 + $0x58] sm:$0xff] }
   0x6   :  { %250 = vmatpush.msra.mxu1 %v1500_v7  ;;  %231 = vmatpush.msra.mxu0 %v1495_v6  ;;  %v1541_v14 = vld [vmem:[%s3497_s2 + $0xe0] sm:$0xff]  ;;  %v1558_v17 = vld [vmem:[%s3497_s2 + $0x158] sm:$0xff]  ;;  %v1577_v20 = vld [vmem:[%s3497_s2 + $0x50] sm:$0xff] }
   0x7   :  { %290 = vmatpush.msra.mxu3 %v1512_v9  ;;  %271 = vmatpush.msra.mxu2 %v1505_v8  ;;  %v1546_v15 = vld [vmem:[%s3497_s2 + $0x1e0] sm:$0xff]  ;;  %v1565_v18 = vld [vmem:[%s3497_s2 + $0xd8] sm:$0xff]  ;;  %v1582_v21 = vld [vmem:[%s3497_s2 + $0x150] sm:$0xff] }
   0x8   :  { %251 = vmatpush.msra.mxu1 %v1517_v10  ;;  %232 = vmatpush.msra.mxu0 %v1524_v11  ;;  %v1570_v19 = vld [vmem:[%s3497_s2 + $0x1d8] sm:$0xff]  ;;  %v1589_v22 = vld [vmem:[%s3497_s2 + $0xd0] sm:$0xff]  ;;  %v1601_v24 = vld [vmem:[%s3497_s2 + $0x48] sm:$0xff] }
   0x9   :  { %291 = vmatpush.msra.mxu3 %v1534_v13  ;;  %272 = vmatpush.msra.mxu2 %v1529_v12  ;;  %v1594_v23 = vld [vmem:[%s3497_s2 + $0x1d0] sm:$0xff]  ;;  %v1606_v25 = vld [vmem:[%s3497_s2 + $0x148] sm:$0xff]  ;;  %v1625_v28 = vld [vmem:[%s3497_s2 + $0x40] sm:$0xff] }
   0xa   :  { %252 = vmatpush.msra.mxu1 %v1541_v14  ;;  %233 = vmatpush.msra.mxu0 %v1553_v16  ;;  %v1613_v26 = vld [vmem:[%s3497_s2 + $0xc8] sm:$0xff]  ;;  %v1630_v29 = vld [vmem:[%s3497_s2 + $0x140] sm:$0xff]  ;;  %v1649_v32 = vld [vmem:[%s3497_s2 + $0x38] sm:$0xff] }
   0xb   :  { %292 = vmatpush.msra.mxu3 %v1546_v15  ;;  %273 = vmatpush.msra.mxu2 %v1558_v17  ;;  %v1618_v27 = vld [vmem:[%s3497_s2 + $0x1c8] sm:$0xff]  ;;  %v1637_v30 = vld [vmem:[%s3497_s2 + $0xc0] sm:$0xff]  ;;  %v1654_v33 = vld [vmem:[%s3497_s2 + $0x138] sm:$0xff] }
   0xc   :  { %253 = vmatpush.msra.mxu1 %v1565_v18  ;;  %234 = vmatpush.msra.mxu0 %v1577_v20  ;;  %v1642_v31 = vld [vmem:[%s3497_s2 + $0x1c0] sm:$0xff]  ;;  %v1661_v34 = vld [vmem:[%s3497_s2 + $0xb8] sm:$0xff]  ;;  %v1673_v36 = vld [vmem:[%s3497_s2 + $0x30] sm:$0xff] }
   0xd   :  { %293 = vmatpush.msra.mxu3 %v1570_v19  ;;  %274 = vmatpush.msra.mxu2 %v1582_v21  ;;  %v1666_v35 = vld [vmem:[%s3497_s2 + $0x1b8] sm:$0xff]  ;;  %v1678_v37 = vld [vmem:[%s3497_s2 + $0x130] sm:$0xff]  ;;  %v1697_v40 = vld [vmem:[%s3497_s2 + $0x28] sm:$0xff] }
   0xe   :  { %254 = vmatpush.msra.mxu1 %v1589_v22  ;;  %235 = vmatpush.msra.mxu0 %v1601_v24  ;;  %v1685_v38 = vld [vmem:[%s3497_s2 + $0xb0] sm:$0xff]  ;;  %3744 = vst [vmem:[#allocation7_spill] sm:$0xff] %v1697_v40  ;;  %v1702_v41 = vld [vmem:[%s3497_s2 + $0x128] sm:$0xff]  ;;  %v1721_v44 = vld [vmem:[%s3497_s2 + $0x20] sm:$0xff] }
   0xf   :  { %294 = vmatpush.msra.mxu3 %v1594_v23  ;;  %275 = vmatpush.msra.mxu2 %v1606_v25  ;;  %3742 = vst [vmem:[#allocation5_spill] sm:$0xff] %v1685_v38  ;;  %v1690_v39 = vld [vmem:[%s3497_s2 + $0x1b0] sm:$0xff]  ;;  %v1709_v42 = vld [vmem:[%s3497_s2 + $0xa8] sm:$0xff]  ;;  %v1726_v45 = vld [vmem:[%s3497_s2 + $0x120] sm:$0xff] }
  0x10   :  { %255 = vmatpush.msra.mxu1 %v1613_v26  ;;  %236 = vmatpush.msra.mxu0 %v1625_v28  ;;  %3743 = vst [vmem:[#allocation6_spill] sm:$0xff] %v1690_v39  ;;  %v1714_v43 = vld [vmem:[%s3497_s2 + $0x1a8] sm:$0xff]  ;;  %v1733_v46 = vld [vmem:[%s3497_s2 + $0xa0] sm:$0xff]  ;;  %v1745_v48 = vld [vmem:[%s3497_s2 + $0x18] sm:$0xff] }
  0x11   :  { %295 = vmatpush.msra.mxu3 %v1618_v27  ;;  %276 = vmatpush.msra.mxu2 %v1630_v29  ;;  %3745 = vst [vmem:[#allocation8_spill] sm:$0xff] %v1702_v41  ;;  %v1738_v47 = vld [vmem:[%s3497_s2 + $0x1a0] sm:$0xff]  ;;  %v1750_v49 = vld [vmem:[%s3497_s2 + $0x118] sm:$0xff]  ;;  %v1769_v52 = vld [vmem:[%s3497_s2 + $0x10] sm:$0xff] }
  0x12   :  { %256 = vmatpush.msra.mxu1 %v1637_v30  ;;  %237 = vmatpush.msra.mxu0 %v1649_v32  ;;  %3746 = vst [vmem:[#allocation9_spill] sm:$0xff] %v1709_v42  ;;  %v1757_v50 = vld [vmem:[%s3497_s2 + $0x98] sm:$0xff]  ;;  %v1774_v53 = vld [vmem:[%s3497_s2 + $0x110] sm:$0xff]  ;;  %v1793_v56 = vld [vmem:[%s3497_s2 + $0x8] sm:$0xff] }
  0x13   :  { %296 = vmatpush.msra.mxu3 %v1642_v31  ;;  %277 = vmatpush.msra.mxu2 %v1654_v33  ;;  %3747 = vst [vmem:[#allocation10_spill] sm:$0xff] %v1714_v43  ;;  %v1762_v51 = vld [vmem:[%s3497_s2 + $0x198] sm:$0xff]  ;;  %v1781_v54 = vld [vmem:[%s3497_s2 + $0x90] sm:$0xff]  ;;  %v1798_v57 = vld [vmem:[%s3497_s2 + $0x108] sm:$0xff] }
  0x14   :  { %257 = vmatpush.msra.mxu1 %v1661_v34  ;;  %238 = vmatpush.msra.mxu0 %v1673_v36  ;;  %3748 = vst [vmem:[#allocation11_spill] sm:$0xff] %v1721_v44  ;;  %v1786_v55 = vld [vmem:[%s3497_s2 + $0x190] sm:$0xff]  ;;  %v1805_v58 = vld [vmem:[%s3497_s2 + $0x88] sm:$0xff]  ;;  %v1817_v60 = vld [vmem:[%s3497_s2] sm:$0xff] }
  0x15   :  { %297 = vmatpush.msra.mxu3 %v1666_v35  ;;  %278 = vmatpush.msra.mxu2 %v1678_v37  ;;  %3749 = vst [vmem:[#allocation12_spill] sm:$0xff] %v1726_v45  ;;  %v1810_v59 = vld [vmem:[%s3497_s2 + $0x188] sm:$0xff]  ;;  %v1822_v61 = vld [vmem:[%s3497_s2 + $0x100] sm:$0xff]  ;;  %v1829_v62 = vld [vmem:[%s3497_s2 + $0x278] sm:$0xff] }
  0x16   :  { %258 = vmatpush.msra.mxu1 %v1685_v38  ;;  %239 = vmatpush.msra.mxu0 %v1697_v40  ;;  %3750 = vst [vmem:[#allocation13_spill] sm:$0xff] %v1733_v46  ;;  %v1834_v63 = vld [vmem:[%s3497_s2 + $0x378] sm:$0xff] }
  0x17   :  { %298 = vmatpush.msra.mxu3 %v1690_v39  ;;  %279 = vmatpush.msra.mxu2 %v1702_v41  ;;  %3751 = vst [vmem:[#allocation14_spill] sm:$0xff] %v1738_v47 }
  0x18   :  { %259 = vmatpush.msra.mxu1 %v1709_v42  ;;  %3752 = vst [vmem:[#allocation15_spill] sm:$0xff] %v1745_v48  ;;  %240 = vmatpush.msra.mxu0 %v1721_v44 }
  0x19   :  { %299 = vmatpush.msra.mxu3 %v1714_v43  ;;  %3753 = vst [vmem:[#allocation16_spill] sm:$0xff] %v1750_v49  ;;  %280 = vmatpush.msra.mxu2 %v1726_v45 }
  0x1a   :  { %3754 = vst [vmem:[#allocation17_spill] sm:$0xff] %v1757_v50  ;;  %260 = vmatpush.msra.mxu1 %v1733_v46  ;;  %241 = vmatpush.msra.mxu0 %v1745_v48 }
  0x1b   :  { %3755 = vst [vmem:[#allocation18_spill] sm:$0xff] %v1762_v51  ;;  %300 = vmatpush.msra.mxu3 %v1738_v47  ;;  %281 = vmatpush.msra.mxu2 %v1750_v49 }
  0x1c   :  { %3756 = vst [vmem:[#allocation19_spill] sm:$0xff] %v1769_v52  ;;  %261 = vmatpush.msra.mxu1 %v1757_v50  ;;  %242 = vmatpush.msra.mxu0 %v1769_v52 }
  0x1d   :  { %3757 = vst [vmem:[#allocation20_spill] sm:$0xff] %v1774_v53  ;;  %301 = vmatpush.msra.mxu3 %v1762_v51  ;;  %282 = vmatpush.msra.mxu2 %v1774_v53  ;;  %v1961_v53 = vld [vmem:[%s3497_s2 + $0x250] sm:$0xff] }
  0x1e   :  { %3758 = vst [vmem:[#allocation21_spill] sm:$0xff] %v1781_v54  ;;  %262 = vmatpush.msra.mxu1 %v1781_v54  ;;  %243 = vmatpush.msra.mxu0 %v1793_v56  ;;  %v1940_v54 = vld [vmem:[%s3496_s1] sm:$0xff] }
  0x1f   :  { %3759 = vst [vmem:[#allocation22_spill] sm:$0xff] %v1786_v55  ;;  %302 = vmatpush.msra.mxu3 %v1786_v55  ;;  %283 = vmatpush.msra.mxu2 %v1798_v57  ;;  %v1923_v55 = vld [vmem:[%s3495_s0] sm:$0xff]  ;;  %vm147_vm0 = vcmp.gt.f32.partialorder %v1940_v54, 0.5 }
  0x20   :  { %3760 = vst [vmem:[#allocation23_spill] sm:$0xff] %v1793_v56  ;;  %263 = vmatpush.msra.mxu1 %v1805_v58  ;;  %v1841_v56 = vld [vmem:[%s3497_s2 + $0x80] sm:$0xff]  ;;  %244 = vmatpush.msra.mxu0 %v1817_v60 }
  0x21   :  { %3761 = vst [vmem:[#allocation24_spill] sm:$0xff] %v1798_v57  ;;  %303 = vmatpush.msra.mxu3 %v1810_v59  ;;  %v1846_v57 = vld [vmem:[%s3497_s2 + $0x180] sm:$0xff]  ;;  %284 = vmatpush.msra.mxu2 %v1822_v61 }
  0x22   :  { %3762 = vst [vmem:[#allocation25_spill] sm:$0xff] %v1805_v58  ;;  %v1853_v58 = vld [vmem:[%s3497_s2 + $0x270] sm:$0xff]  ;;  %309 = vmatpush.msrb.mxu0 %v1829_v62  ;;  %264 = vmatpush.msra.mxu1 %v1841_v56 }
  0x23   :  { %3763 = vst [vmem:[#allocation26_spill] sm:$0xff] %v1810_v59  ;;  %v1858_v59 = vld [vmem:[%s3497_s2 + $0x2f8] sm:$0xff]  ;;  %349 = vmatpush.msrb.mxu2 %v1834_v63  ;;  %304 = vmatpush.msra.mxu3 %v1846_v57 }
  0x24   :  { %3764 = vst [vmem:[#allocation27_spill] sm:$0xff] %v1817_v60  ;;  %v1865_v60 = vld [vmem:[%s3497_s2 + $0x370] sm:$0xff]  ;;  %310 = vmatpush.msrb.mxu0 %v1853_v58  ;;  %329 = vmatpush.msrb.mxu1 %v1858_v59 }
  0x25   :  { %3765 = vst [vmem:[#allocation28_spill] sm:$0xff] %v1822_v61  ;;  %v1870_v61 = vld [vmem:[%s3497_s2 + $0x3f8] sm:$0xff]  ;;  %350 = vmatpush.msrb.mxu2 %v1865_v60 }
  0x26   :  { %3766 = vst [vmem:[#allocation29_spill] sm:$0xff] %v1829_v62  ;;  %v1877_v62 = vld [vmem:[%s3497_s2 + $0x268] sm:$0xff]  ;;  %369 = vmatpush.msrb.mxu3 %v1870_v61 }
  0x27   :  { %3767 = vst [vmem:[#allocation30_spill] sm:$0xff] %v1834_v63  ;;  %v1882_v63 = vld [vmem:[%s3497_s2 + $0x2f0] sm:$0xff]  ;;  %311 = vmatpush.msrb.mxu0 %v1877_v62 }
  0x28   :  { %3768 = vst [vmem:[#allocation31_spill] sm:$0xff] %v1841_v56  ;;  %v1889_v56 = vld [vmem:[%s3497_s2 + $0x368] sm:$0xff]  ;;  %330 = vmatpush.msrb.mxu1 %v1882_v63 }
  0x29   :  { %3769 = vst [vmem:[#allocation32_spill] sm:$0xff] %v1846_v57  ;;  %v1894_v57 = vld [vmem:[%s3497_s2 + $0x3f0] sm:$0xff]  ;;  %351 = vmatpush.msrb.mxu2 %v1889_v56 }
  0x2a   :  { %3770 = vst [vmem:[#allocation33_spill] sm:$0xff] %v1853_v58  ;;  %v1901_v58 = vld [vmem:[%s3497_s2 + $0x260] sm:$0xff]  ;;  %370 = vmatpush.msrb.mxu3 %v1894_v57 }
  0x2b   :  { %3771 = vst [vmem:[#allocation34_spill] sm:$0xff] %v1858_v59  ;;  %v1906_v59 = vld [vmem:[%s3497_s2 + $0x2e8] sm:$0xff]  ;;  %312 = vmatpush.msrb.mxu0 %v1901_v58 }
  0x2c   :  { %3772 = vst [vmem:[#allocation35_spill] sm:$0xff] %v1865_v60  ;;  %v1913_v60 = vld [vmem:[%s3497_s2 + $0x360] sm:$0xff]  ;;  %331 = vmatpush.msrb.mxu1 %v1906_v59 }
  0x2d   :  { %3773 = vst [vmem:[#allocation36_spill] sm:$0xff] %v1870_v61  ;;  %v1918_v61 = vld [vmem:[%s3497_s2 + $0x3e8] sm:$0xff]  ;;  %352 = vmatpush.msrb.mxu2 %v1913_v60 }
  0x2e   :  { %3774 = vst [vmem:[#allocation37_spill] sm:$0xff] %v1877_v62  ;;  %v1935_v62 = vld [vmem:[%s3497_s2 + $0x2e0] sm:$0xff]  ;;  %371 = vmatpush.msrb.mxu3 %v1918_v61 }
  0x2f   :  { %3775 = vst [vmem:[#allocation38_spill] sm:$0xff] %v1882_v63  ;;  %v1930_v63 = vld [vmem:[%s3497_s2 + $0x258] sm:$0xff]  ;;  %332 = vmatpush.msrb.mxu1 %v1935_v62 }
  0x30   :  { %3776 = vst [vmem:[#allocation39_spill] sm:$0xff] %v1889_v56  ;;  %v1953_v56 = vld [vmem:[%s3497_s2 + $0x3e0] sm:$0xff]  ;;  %313 = vmatpush.msrb.mxu0 %v1930_v63 }
  0x31   :  { %3777 = vst [vmem:[#allocation40_spill] sm:$0xff] %v1894_v57  ;;  %v1948_v57 = vld [vmem:[%s3497_s2 + $0x358] sm:$0xff]  ;;  %372 = vmatpush.msrb.mxu3 %v1953_v56 }
  0x32   :  { %3778 = vst [vmem:[#allocation41_spill] sm:$0xff] %v1901_v58  ;;  %v3790_v58 = vsub.f32 1.0, %v1923_v55  ;;  %353 = vmatpush.msrb.mxu2 %v1948_v57  ;;  %314 = vmatpush.msrb.mxu0 %v1961_v53 }
  0x33   :  { %3779 = vst [vmem:[#allocation42_spill] sm:$0xff] %v1906_v59  ;;  %v1966_v59 = vld [vmem:[%s3497_s2 + $0x2d8] sm:$0xff] }
  0x34   :  { %3780 = vst [vmem:[#allocation43_spill] sm:$0xff] %v1913_v60  ;;  %v151_v52 = vsel %vm147_vm0, %v1923_v55, %v3790_v58  ;;  %v1981_v60 = vld [vmem:[%s3497_s2 + $0x3d8] sm:$0xff]  ;;  %v1988_v58 = vld [vmem:[%s3497_s2 + $0x248] sm:$0xff]  ;;  %333 = vmatpush.msrb.mxu1 %v1966_v59 }
  0x35   :  { %3781 = vst [vmem:[#allocation44_spill] sm:$0xff] %v1918_v61  ;;  %v1976_v61 = vld [vmem:[%s3497_s2 + $0x350] sm:$0xff]  ;;  %1265 = vlog2.f32 %v151_v52  ;;  %373 = vmatpush.msrb.mxu3 %v1981_v60 }
  0x36   :  { %3782 = vst [vmem:[#allocation45_spill] sm:$0xff] %v1923_v55  ;;  %v2005_v52 = vld [vmem:[%s3497_s2 + $0x3d0] sm:$0xff]  ;;  %354 = vmatpush.msrb.mxu2 %v1976_v61 }
  0x37   :  { %3783 = vst [vmem:[#allocation46_spill] sm:$0xff] %v1930_v63  ;;  %v1998_v63 = vld [vmem:[%s3497_s2 + $0x348] sm:$0xff] }
  0x38   :  { %3784 = vst [vmem:[#allocation47_spill] sm:$0xff] %v1935_v62  ;;  %v1993_v62 = vld [vmem:[%s3497_s2 + $0x2d0] sm:$0xff] }
  0x39   :  { %3785 = vst [vmem:[#allocation48_spill] sm:$0xff] %v1940_v54 }
  0x3a   :  { %3786 = vst [vmem:[#allocation49_spill] sm:$0xff] %v1948_v57  ;;  %v2015_v57 = vld [vmem:[%s3495_s0 + $0x8] sm:$0xff] }
  0x3b   :  { %3787 = vst [vmem:[#allocation50_spill] sm:$0xff] %v1953_v56  ;;  %v2010_v56 = vld [vmem:[%s3497_s2 + $0x240] sm:$0xff] }
  0x3c   :  { %3788 = vst [vmem:[#allocation51_spill] sm:$0xff] %v1961_v53  ;;  %v2027_v53 = vld [vmem:[%s3496_s1 + $0x8] sm:$0xff] }
  0x3d   :  { %3789 = vst [vmem:[#allocation52_spill] sm:$0xff] %v1966_v59  ;;  %v2022_v59 = vld [vmem:[%s3497_s2 + $0x2c8] sm:$0xff] }
  0x3e   :  { %3791 = vst [vmem:[#allocation53_spill] sm:$0xff] %v1976_v61 }
  0x3f   :  { %3792 = vst [vmem:[#allocation54_spill] sm:$0xff] %v1981_v60 }
  0x40   :  { %3793 = vst [vmem:[#allocation55_spill] sm:$0xff] %v1988_v58 }
  0x41   :  { %3794 = vst [vmem:[#allocation56_spill] sm:$0xff] %v1993_v62 }
  0x42   :  { %3795 = vst [vmem:[#allocation57_spill] sm:$0xff] %v1998_v63 }
  0x43   :  { %3796 = vst [vmem:[#allocation58_spill] sm:$0xff] %v2005_v52 }
  0x44   :  { %3797 = vst [vmem:[#allocation59_spill] sm:$0xff] %v2010_v56 }
  0x45   :  { %3798 = vst [vmem:[#allocation60_spill] sm:$0xff] %v2015_v57 }
  0x46   :  { %3799 = vst [vmem:[#allocation61_spill] sm:$0xff] %v2022_v59 }
  0x47   :  { %3800 = vst [vmem:[#allocation62_spill] sm:$0xff] %v2027_v53 }
  0x48   :  { %8 = vsyncpa [#allocation3], 0  ;;  %315 = vmatpush.msrb.mxu0 %v1988_v58  ;;  %334 = vmatpush.msrb.mxu1 %v1993_v62  ;;  %v2035_v60 = vld [vmem:[%s3497_s2 + $0x340] sm:$0xff]  ;;  %v2040_v61 = vld [vmem:[%s3497_s2 + $0x3c8] sm:$0xff]  ;;  %vm148_vm1 = vcmp.gt.f32.partialorder %v2027_v53, 0.5  ;;  %v3805_v58 = vsub.f32 1.0, %v2015_v57  ;;  %v1266_v49 = vpop.eup %1265 }
  0x49   :  { %3801 = vst [vmem:[#allocation63_spill] sm:$0xff] %v2035_v60  ;;  %355 = vmatpush.msrb.mxu2 %v1998_v63  ;;  %374 = vmatpush.msrb.mxu3 %v2005_v52  ;;  %v2048_v51 = vld [vmem:[%s3497_s2 + $0x238] sm:$0xff]  ;;  %v2053_v62 = vld [vmem:[%s3497_s2 + $0x2c0] sm:$0xff]  ;;  %v2203_v47 = vld [vmem:[%s3497_s2 + $0x308] sm:$0xff]  ;;  %s1435_s29 = smov 32   ;;  %vm180_vm12 = vcmask 1041408  }
  0x4a   :  { %3802 = vst [vmem:[#allocation64_spill] sm:$0xff] %v2040_v61  ;;  %v152_v50 = vsel %vm148_vm1, %v2015_v57, %v3805_v58  ;;  %316 = vmatpush.msrb.mxu0 %v2010_v56  ;;  %335 = vmatpush.msrb.mxu1 %v2022_v59  ;;  %v2063_v52 = vld [vmem:[%s3497_s2 + $0x338] sm:$0xff]  ;;  %v2068_v63 = vld [vmem:[%s3497_s2 + $0x3c0] sm:$0xff]  ;;  %v2075_v58 = vld [vmem:[%s3497_s2 + $0x230] sm:$0xff]  ;;  %v154_v56 = vmul.f32 0.6931472, %v1266_v49 }
  0x4b   :  { %3803 = vst [vmem:[#allocation65_spill] sm:$0xff] %v2048_v51  ;;  %1267 = vlog2.f32 %v152_v50  ;;  %356 = vmatpush.msrb.mxu2 %v2035_v60  ;;  %375 = vmatpush.msrb.mxu3 %v2040_v61  ;;  %v2080_v59 = vld [vmem:[%s3497_s2 + $0x2b8] sm:$0xff]  ;;  %v2087_v50 = vld [vmem:[%s3497_s2 + $0x330] sm:$0xff]  ;;  %v2099_v49 = vld [vmem:[%s3497_s2 + $0x228] sm:$0xff]  ;;  %vm1179_vm14 = vcmask 254976   ;;  %s1437_s4 = smov [#allocation2]  }
  0x4c   :  { %3804 = vst [vmem:[#allocation66_spill] sm:$0xff] %v2053_v62  ;;  %317 = vmatpush.msrb.mxu0 %v2048_v51  ;;  %336 = vmatpush.msrb.mxu1 %v2053_v62  ;;  %v2092_v61 = vld [vmem:[%s3497_s2 + $0x3b8] sm:$0xff]  ;;  %v2104_v62 = vld [vmem:[%s3497_s2 + $0x2b0] sm:$0xff]  ;;  %v157_v51 = vmax.f32 %v154_v56, -100.0  ;;  %v2123_v56 = vld [vmem:[%s3497_s2 + $0x220] sm:$0xff]  ;;  %s1243_s5 = sshll.u32 %s1437_s4, 4  ;;  %s1244_s5 = int_to_ptr.vmem [resolvable:$true] %s1243_s5 }
  0x4d   :  { %3806 = vst [vmem:[#allocation67_spill] sm:$0xff] %v2063_v52  ;;  %357 = vmatpush.msrb.mxu2 %v2063_v52  ;;  %376 = vmatpush.msrb.mxu3 %v2068_v63  ;;  %v2111_v52 = vld [vmem:[%s3497_s2 + $0x328] sm:$0xff]  ;;  %v2169_v60 = vld [vmem:[%s3497_s2 + $0x210] sm:$0xff]  ;;  %s1245_s8 = sshll.u32 %s3498_s3, 4  ;;  %s1246_s8 = int_to_ptr.hbm [resolvable:$true] %s1245_s8 }
  0x4e   :  { %3807 = vst [vmem:[#allocation68_spill] sm:$0xff] %v2068_v63  ;;  %318 = vmatpush.msrb.mxu0 %v2075_v58  ;;  %337 = vmatpush.msrb.mxu1 %v2080_v59  ;;  %v2116_v63 = vld [vmem:[%s3497_s2 + $0x3b0] sm:$0xff] }
  0x4f   :  { %3808 = vst [vmem:[#allocation69_spill] sm:$0xff] %v2075_v58  ;;  %358 = vmatpush.msrb.mxu2 %v2087_v50  ;;  %377 = vmatpush.msrb.mxu3 %v2092_v61 }
  0x50   :  { %3809 = vst [vmem:[#allocation70_spill] sm:$0xff] %v2080_v59  ;;  %v2128_v59 = vld [vmem:[%s3497_s2 + $0x2a8] sm:$0xff]  ;;  %319 = vmatpush.msrb.mxu0 %v2099_v49  ;;  %338 = vmatpush.msrb.mxu1 %v2104_v62 }
  0x51   :  { %3810 = vst [vmem:[#allocation71_spill] sm:$0xff] %v2087_v50  ;;  %v1268_v58 = vpop.eup %1267  ;;  %v2140_v50 = vld [vmem:[%s3497_s2 + $0x3a8] sm:$0xff]  ;;  %359 = vmatpush.msrb.mxu2 %v2111_v52  ;;  %378 = vmatpush.msrb.mxu3 %v2116_v63 }
  0x52   :  { %3811 = vst [vmem:[#allocation72_spill] sm:$0xff] %v2092_v61  ;;  %v2135_v61 = vld [vmem:[%s3497_s2 + $0x320] sm:$0xff]  ;;  %320 = vmatpush.msrb.mxu0 %v2123_v56  ;;  %339 = vmatpush.msrb.mxu1 %v2128_v59 }
  0x53   :  { %3812 = vst [vmem:[#allocation73_spill] sm:$0xff] %v2099_v49  ;;  %v156_v49 = vmul.f32 0.6931472, %v1268_v58  ;;  %360 = vmatpush.msrb.mxu2 %v2135_v61  ;;  %379 = vmatpush.msrb.mxu3 %v2140_v50  ;;  %v2176_v58 = vld [vmem:[%s3497_s2 + $0x298] sm:$0xff] }
  0x54   :  { %3813 = vst [vmem:[#allocation74_spill] sm:$0xff] %v2104_v62  ;;  %v2152_v62 = vld [vmem:[%s3497_s2 + $0x2a0] sm:$0xff] }
  0x55   :  { %3814 = vst [vmem:[#allocation75_spill] sm:$0xff] %v2111_v52  ;;  %v2159_v52 = vld [vmem:[%s3497_s2 + $0x318] sm:$0xff]  ;;  %v158_v48 = vmax.f32 %v156_v49, -100.0  ;;  %340 = vmatpush.msrb.mxu1 %v2152_v62  ;;  %v2210_v49 = vld [vmem:[%s3497_s2 + $0x390] sm:$0xff] }
  0x56   :  { %3815 = vst [vmem:[#allocation76_spill] sm:$0xff] %v2116_v63  ;;  %v2164_v63 = vld [vmem:[%s3497_s2 + $0x3a0] sm:$0xff]  ;;  %361 = vmatpush.msrb.mxu2 %v2159_v52 }
  0x57   :  { %3816 = vst [vmem:[#allocation77_spill] sm:$0xff] %v2123_v56  ;;  %v2186_v56 = vld [vmem:[%s3497_s2 + $0x398] sm:$0xff]  ;;  %380 = vmatpush.msrb.mxu3 %v2164_v63  ;;  %341 = vmatpush.msrb.mxu1 %v2176_v58 }
  0x58   :  { %3817 = vst [vmem:[#allocation78_spill] sm:$0xff] %v2128_v59  ;;  %v2181_v59 = vld [vmem:[%s3497_s2 + $0x310] sm:$0xff] }
  0x59   :  { %161 = vst [vmem:[#allocation1] ss:$4 sm:$0xff] %v157_v51  ;;  %v2147_v51 = vld [vmem:[%s3497_s2 + $0x218] sm:$0xff]  ;;  %362 = vmatpush.msrb.mxu2 %v2181_v59  ;;  %381 = vmatpush.msrb.mxu3 %v2186_v56 }
  0x5a   :  { %3818 = vst [vmem:[#allocation79_spill] sm:$0xff] %v2135_v61  ;;  %321 = vmatpush.msrb.mxu0 %v2147_v51  ;;  %v2198_v61 = vld [vmem:[%s3497_s2 + $0x290] sm:$0xff] }
  0x5b   :  { %3819 = vst [vmem:[#allocation80_spill] sm:$0xff] %v2140_v50  ;;  %v2193_v50 = vld [vmem:[%s3497_s2 + $0x208] sm:$0xff]  ;;  %342 = vmatpush.msrb.mxu1 %v2198_v61  ;;  %363 = vmatpush.msrb.mxu2 %v2203_v47 }
  0x5c   :  { %3820 = vst [vmem:[#allocation81_spill] sm:$0xff] %v2147_v51  ;;  %v2220_v51 = vld [vmem:[%s3497_s2 + $0x288] sm:$0xff]  ;;  %322 = vmatpush.msrb.mxu0 %v2169_v60  ;;  %382 = vmatpush.msrb.mxu3 %v2210_v49 }
  0x5d   :  { %3821 = vst [vmem:[#allocation82_spill] sm:$0xff] %v2152_v62  ;;  %v2215_v62 = vld [vmem:[%s3497_s2 + $0x200] sm:$0xff]  ;;  %343 = vmatpush.msrb.mxu1 %v2220_v51 }
  0x5e   :  { %3822 = vst [vmem:[#allocation83_spill] sm:$0xff] %v2159_v52  ;;  %323 = vmatpush.msrb.mxu0 %v2193_v50 }
  0x5f   :  { %3823 = vst [vmem:[#allocation84_spill] sm:$0xff] %v2164_v63 }
  0x60   :  { %3824 = vst [vmem:[#allocation85_spill] sm:$0xff] %v2169_v60  ;;  %v2222_v46 = vld.sshfl [vmem:[#allocation1] sm:$0xff pattern:$0x73625140]  ;;  %324 = vmatpush.msrb.mxu0 %v2215_v62 }
  0x61   :  { %3825 = vst [vmem:[#allocation86_spill] sm:$0xff] %v2176_v58  ;;  %v2224_v52 = vld.sshfl [vmem:[#allocation1 + $0x8] sm:$0xff pattern:$0x73625140] }
  0x62   :  { %3826 = vst [vmem:[#allocation87_spill] sm:$0xff] %v2198_v61  ;;  %v2228_v63 = vld.sshfl [vmem:[#allocation1 + $0x10] sm:$0xff pattern:$0x73625140] }
  0x63   :  { %3827 = vst [vmem:[#allocation88_spill] sm:$0xff] %v2203_v47  ;;  %v2230_v45 = vld.sshfl [vmem:[#allocation1 + $0x18] sm:$0xff pattern:$0x73625140] }
  0x64   :  { %3828 = vst [vmem:[#allocation89_spill] sm:$0xff] %v2210_v49 }
  0x65   :  { %3829 = vst [vmem:[#allocation90_spill] sm:$0xff] %v2215_v62  ;;  %v389_v62 = vmul.f32 %v1940_v54, %v1923_v55 }
  0x66   :  { %3830 = vst [vmem:[#allocation91_spill] sm:$0xff] %v2220_v51 }
  0x67   :  { %163 = vst [vmem:[#allocation1 + $0x20] ss:$4 sm:$0xff] %v158_v48  ;;  %v2240_v48 = vld [vmem:[%s3497_s2 + $0x300] sm:$0xff] }
  0x68   :  { %3831 = vst [vmem:[#allocation92_spill] sm:$0xff] %v2222_v46  ;;  %364 = vmatpush.msrb.mxu2 %v2240_v48 }
  0x69   :  { %3832 = vst [vmem:[#allocation93_spill] sm:$0xff] %v2224_v52  ;;  %v2259_v52 = vld [vmem:[%s3497_s2 + $0x380] sm:$0xff] }
  0x6a   :  { %3833 = vst [vmem:[#allocation94_spill] sm:$0xff] %v2228_v63  ;;  %v2245_v63 = vld [vmem:[%s3497_s2 + $0x388] sm:$0xff] }
  0x6b   :  { %3834 = vst [vmem:[#allocation95_spill] sm:$0xff] %v2230_v45  ;;  %v2252_v45 = vld [vmem:[%s3497_s2 + $0x280] sm:$0xff]  ;;  %383 = vmatpush.msrb.mxu3 %v2245_v63 }
  0x6c   :  { %210 = vst [vmem:[#allocation1] ss:$4 sm:$0xff] %v1923_v55  ;;  %344 = vmatpush.msrb.mxu1 %v2252_v45  ;;  %v3850_v55 = vld [vmem:[#allocation21_spill] sm:$0xff] }
  0x6d   :  { %3835 = vst [vmem:[#allocation96_spill] sm:$0xff] %v2240_v48  ;;  %384 = vmatpush.msrb.mxu3 %v2259_v52 }
  0x6e   :  { %3836 = vst [vmem:[#allocation97_spill] sm:$0xff] %v2245_v63  ;;  %v2263_v46 = vld.sshfl [vmem:[#allocation1 + $0x20] sm:$0xff pattern:$0x73625140] }
  0x6f   :  { %3837 = vst [vmem:[#allocation98_spill] sm:$0xff] %v2263_v46  ;;  %v2265_v49 = vld.sshfl [vmem:[#allocation1 + $0x28] sm:$0xff pattern:$0x73625140] }
  0x70   :  { %3838 = vst [vmem:[#allocation99_spill] sm:$0xff] %v2265_v49  ;;  %v2270_v47 = vld.sshfl [vmem:[#allocation1 + $0x30] sm:$0xff pattern:$0x73625140]  ;;  %v3848_v49 = vld [vmem:[#allocation19_spill] sm:$0xff] }
  0x71   :  { %3839 = vst [vmem:[#allocation100_spill] sm:$0xff] %v2270_v47  ;;  %v2272_v51 = vld.sshfl [vmem:[#allocation1 + $0x38] sm:$0xff pattern:$0x73625140] }
  0x72   :  { %3840 = vst [vmem:[#allocation101_spill] sm:$0xff] %v2272_v51  ;;  %v390_v51 = vmul.f32 %v2027_v53, %v2015_v57  ;;  %v3847_v47 = vld [vmem:[#allocation18_spill] sm:$0xff] }
  0x73   :  { %212 = vst [vmem:[#allocation1 + $0x20] ss:$4 sm:$0xff] %v2015_v57  ;;  %v215_v48 = vld.sshfl [vmem:[#allocation1 + $0x10] sm:$0xff pattern:$0x73625140]  ;;  %v3849_v57 = vld [vmem:[#allocation20_spill] sm:$0xff] }
  0x74   :  { %v213_v61 = vld.sshfl [vmem:[#allocation1] sm:$0xff pattern:$0x73625140]  ;;  %285 = vmatmul.f32.vlgmr.msra.gmra.mxu2 %v215_v48  ;;  %v216_v46 = vld.sshfl [vmem:[#allocation1 + $0x18] sm:$0xff pattern:$0x73625140] }
  0x75   :  { %245 = vmatmul.f32.vlgmr.msra.gmra.mxu0 %v213_v61  ;;  %v214_v63 = vld.sshfl [vmem:[#allocation1 + $0x8] sm:$0xff pattern:$0x73625140]  ;;  %305 = vmatmul.f32.vlgmr.msra.gmra.mxu3 %v216_v46 }
  0x76   :  { %265 = vmatmul.f32.vlgmr.msra.gmra.mxu1 %v214_v63  ;;  %393 = vst [vmem:[#allocation1] ss:$4 sm:$0xff] %v389_v62  ;;  %412 = vmatpush.msra.mxu0 %v1461_v0  ;;  %v3841_v63 = vld [vmem:[#allocation12_spill] sm:$0xff] }
  0x77   :  { %452 = vmatpush.msra.mxu2 %v1466_v1  ;;  %432 = vmatpush.msra.mxu1 %v1478_v3 }
  0x78   :  { %472 = vmatpush.msra.mxu3 %v1488_v5  ;;  %413 = vmatpush.msra.mxu0 %v1471_v2 }
  0x79   :  { %453 = vmatpush.msra.mxu2 %v1483_v4  ;;  %433 = vmatpush.msra.mxu1 %v1500_v7 }
  0x7a   :  { %v219_v61 = vld.sshfl [vmem:[#allocation1 + $0x30] sm:$0xff pattern:$0x73625140]  ;;  %v217_v48 = vld.sshfl [vmem:[#allocation1 + $0x20] sm:$0xff pattern:$0x73625140]  ;;  %473 = vmatpush.msra.mxu3 %v1512_v9  ;;  %414 = vmatpush.msra.mxu0 %v1495_v6 }
  0x7b   :  { %v220_v46 = vld.sshfl [vmem:[#allocation1 + $0x38] sm:$0xff pattern:$0x73625140]  ;;  %v218_v62 = vld.sshfl [vmem:[#allocation1 + $0x28] sm:$0xff pattern:$0x73625140]  ;;  %454 = vmatpush.msra.mxu2 %v1505_v8  ;;  %434 = vmatpush.msra.mxu1 %v1517_v10 }
  0x7c   :  { %395 = vst [vmem:[#allocation1 + $0x20] ss:$4 sm:$0xff] %v390_v51  ;;  %474 = vmatpush.msra.mxu3 %v1534_v13  ;;  %365 = vmatmul.f32.vlgmr.msrb.gmra.mxu2 %v219_v61  ;;  %v3842_v51 = vld [vmem:[#allocation13_spill] sm:$0xff]  ;;  %v3843_v61 = vld [vmem:[#allocation14_spill] sm:$0xff] }
  0x7d   :  { %325 = vmatmul.f32.vlgmr.msrb.gmra.mxu0 %v217_v48  ;;  %385 = vmatmul.f32.vlgmr.msrb.gmra.mxu3 %v220_v46  ;;  %v3844_v48 = vld [vmem:[#allocation15_spill] sm:$0xff]  ;;  %v3845_v46 = vld [vmem:[#allocation16_spill] sm:$0xff] }
  0x7e   :  { %345 = vmatmul.f32.vlgmr.msrb.gmra.mxu1 %v218_v62  ;;  %415 = vmatpush.msra.mxu0 %v1524_v11  ;;  %v3846_v62 = vld [vmem:[#allocation17_spill] sm:$0xff] }
  0x7f   :  { %455 = vmatpush.msra.mxu2 %v1529_v12  ;;  %435 = vmatpush.msra.mxu1 %v1541_v14 }
  0x80   :  { %475 = vmatpush.msra.mxu3 %v1546_v15  ;;  %416 = vmatpush.msra.mxu0 %v1553_v16 }
  0x81   :  { %456 = vmatpush.msra.mxu2 %v1558_v17  ;;  %436 = vmatpush.msra.mxu1 %v1565_v18 }
  0x82   :  { %476 = vmatpush.msra.mxu3 %v1570_v19  ;;  %417 = vmatpush.msra.mxu0 %v1577_v20 }
  0x83   :  { %457 = vmatpush.msra.mxu2 %v1582_v21  ;;  %437 = vmatpush.msra.mxu1 %v1589_v22 }
  0x84   :  { %477 = vmatpush.msra.mxu3 %v1594_v23  ;;  %418 = vmatpush.msra.mxu0 %v1601_v24 }
  0x85   :  { %458 = vmatpush.msra.mxu2 %v1606_v25  ;;  %438 = vmatpush.msra.mxu1 %v1613_v26 }
  0x86   :  { %478 = vmatpush.msra.mxu3 %v1618_v27  ;;  %419 = vmatpush.msra.mxu0 %v1625_v28 }
  0x87   :  { %459 = vmatpush.msra.mxu2 %v1630_v29  ;;  %439 = vmatpush.msra.mxu1 %v1637_v30 }
  0x88   :  { %479 = vmatpush.msra.mxu3 %v1642_v31  ;;  %420 = vmatpush.msra.mxu0 %v1649_v32 }
  0x89   :  { %460 = vmatpush.msra.mxu2 %v1654_v33  ;;  %440 = vmatpush.msra.mxu1 %v1661_v34 }
  0x8a   :  { %480 = vmatpush.msra.mxu3 %v1666_v35  ;;  %421 = vmatpush.msra.mxu0 %v1673_v36 }
  0x8b   :  { %461 = vmatpush.msra.mxu2 %v1678_v37  ;;  %441 = vmatpush.msra.mxu1 %v1685_v38  ;;  %v3884_v38 = vld [vmem:[#allocation57_spill] sm:$0xff] }
  0x8c   :  { %481 = vmatpush.msra.mxu3 %v1690_v39  ;;  %422 = vmatpush.msra.mxu0 %v1697_v40  ;;  %v3875_v39 = vld [vmem:[#allocation47_spill] sm:$0xff]  ;;  %v3894_v40 = vld [vmem:[#allocation69_spill] sm:$0xff] }
  0x8d   :  { %462 = vmatpush.msra.mxu2 %v1702_v41  ;;  %442 = vmatpush.msra.mxu1 %v1709_v42  ;;  %v3871_v42 = vld [vmem:[#allocation42_spill] sm:$0xff]  ;;  %v3878_v41 = vld [vmem:[#allocation51_spill] sm:$0xff] }
  0x8e   :  { %482 = vmatpush.msra.mxu3 %v1714_v43  ;;  %423 = vmatpush.msra.mxu0 %v1721_v44  ;;  %v3851_v43 = vld [vmem:[#allocation22_spill] sm:$0xff] }
  0x8f   :  { %463 = vmatpush.msra.mxu2 %v3841_v63  ;;  %443 = vmatpush.msra.mxu1 %v3842_v51  ;;  %v3852_v63 = vld [vmem:[#allocation23_spill] sm:$0xff]  ;;  %v3853_v51 = vld [vmem:[#allocation24_spill] sm:$0xff]  ;;  %v3874_v44 = vld [vmem:[#allocation46_spill] sm:$0xff] }
  0x90   :  { %483 = vmatpush.msra.mxu3 %v3843_v61  ;;  %424 = vmatpush.msra.mxu0 %v3844_v48  ;;  %v3854_v61 = vld [vmem:[#allocation25_spill] sm:$0xff]  ;;  %v3855_v48 = vld [vmem:[#allocation26_spill] sm:$0xff] }
  0x91   :  { %464 = vmatpush.msra.mxu2 %v3845_v46  ;;  %444 = vmatpush.msra.mxu1 %v3846_v62  ;;  %v3856_v46 = vld [vmem:[#allocation27_spill] sm:$0xff]  ;;  %v3857_v62 = vld [vmem:[#allocation28_spill] sm:$0xff] }
  0x92   :  { %484 = vmatpush.msra.mxu3 %v3847_v47  ;;  %425 = vmatpush.msra.mxu0 %v3848_v49  ;;  %v3858_v47 = vld [vmem:[#allocation29_spill] sm:$0xff]  ;;  %v3859_v49 = vld [vmem:[#allocation30_spill] sm:$0xff] }
  0x93   :  { %465 = vmatpush.msra.mxu2 %v3849_v57  ;;  %445 = vmatpush.msra.mxu1 %v3850_v55  ;;  %v3860_v57 = vld [vmem:[#allocation31_spill] sm:$0xff]  ;;  %v3861_v55 = vld [vmem:[#allocation32_spill] sm:$0xff] }
  0x94   :  { %485 = vmatpush.msra.mxu3 %v3851_v43  ;;  %426 = vmatpush.msra.mxu0 %v3852_v63  ;;  %v3862_v43 = vld [vmem:[#allocation33_spill] sm:$0xff]  ;;  %v3863_v63 = vld [vmem:[#allocation34_spill] sm:$0xff] }
  0x95   :  { %466 = vmatpush.msra.mxu2 %v3853_v51  ;;  %446 = vmatpush.msra.mxu1 %v3854_v61  ;;  %v2346_v51 = vld.sshfl [vmem:[#allocation1 + $0x10] sm:$0xff pattern:$0x73625140]  ;;  %v2348_v61 = vld.sshfl [vmem:[#allocation1] sm:$0xff pattern:$0x73625140] }
  0x96   :  { %486 = vmatpush.msra.mxu3 %v3855_v48  ;;  %427 = vmatpush.msra.mxu0 %v3856_v46  ;;  %v3864_v48 = vld [vmem:[#allocation35_spill] sm:$0xff]  ;;  %v3865_v46 = vld [vmem:[#allocation36_spill] sm:$0xff] }
  0x97   :  { %467 = vmatpush.msra.mxu2 %v3857_v62  ;;  %447 = vmatpush.msra.mxu1 %v3860_v57  ;;  %v2352_v62 = vld.sshfl [vmem:[#allocation1 + $0x18] sm:$0xff pattern:$0x73625140] }
  0x98   :  { %492 = vmatpush.msrb.mxu0 %v3858_v47  ;;  %487 = vmatpush.msra.mxu3 %v3861_v55  ;;  %v2354_v47 = vld.sshfl [vmem:[#allocation1 + $0x8] sm:$0xff pattern:$0x73625140]  ;;  %v3867_v57 = vld [vmem:[#allocation38_spill] sm:$0xff]  ;;  %v3870_v55 = vld [vmem:[#allocation41_spill] sm:$0xff] }
  0x99   :  { %532 = vmatpush.msrb.mxu2 %v3859_v49  ;;  %512 = vmatpush.msrb.mxu1 %v3863_v63  ;;  %v3866_v49 = vld [vmem:[#allocation37_spill] sm:$0xff]  ;;  %574 = vst [vmem:[#allocation1] ss:$4 sm:$0xff] %v1940_v54  ;;  %v3869_v63 = vld [vmem:[#allocation40_spill] sm:$0xff]  ;;  %v3895_v54 = vld [vmem:[#allocation70_spill] sm:$0xff] }
  0x9a   :  { %493 = vmatpush.msrb.mxu0 %v3862_v43  ;;  %552 = vmatpush.msrb.mxu3 %v3865_v46  ;;  %v3868_v43 = vld [vmem:[#allocation39_spill] sm:$0xff]  ;;  %v3873_v46 = vld [vmem:[#allocation44_spill] sm:$0xff] }
  0x9b   :  { %533 = vmatpush.msrb.mxu2 %v3864_v48  ;;  %513 = vmatpush.msrb.mxu1 %v3867_v57  ;;  %v3872_v48 = vld [vmem:[#allocation43_spill] sm:$0xff]  ;;  %v3877_v57 = vld [vmem:[#allocation50_spill] sm:$0xff] }
  0x9c   :  { %494 = vmatpush.msrb.mxu0 %v3866_v49  ;;  %553 = vmatpush.msrb.mxu3 %v3869_v63  ;;  %v3876_v49 = vld [vmem:[#allocation49_spill] sm:$0xff] }
  0x9d   :  { %534 = vmatpush.msrb.mxu2 %v3868_v43  ;;  %514 = vmatpush.msrb.mxu1 %v3871_v42  ;;  %v3879_v43 = vld [vmem:[#allocation52_spill] sm:$0xff]  ;;  %v3880_v63 = vld [vmem:[#allocation53_spill] sm:$0xff]  ;;  %v3882_v42 = vld [vmem:[#allocation55_spill] sm:$0xff] }
  0x9e   :  { %495 = vmatpush.msrb.mxu0 %v3870_v55  ;;  %554 = vmatpush.msrb.mxu3 %v3873_v46  ;;  %v3881_v55 = vld [vmem:[#allocation54_spill] sm:$0xff]  ;;  %v402_v46 = vld.sshfl [vmem:[#allocation1 + $0x30] sm:$0xff pattern:$0x73625140] }
  0x9f   :  { %535 = vmatpush.msrb.mxu2 %v3872_v48  ;;  %515 = vmatpush.msrb.mxu1 %v3875_v39  ;;  %v3883_v48 = vld [vmem:[#allocation56_spill] sm:$0xff]  ;;  %v3885_v39 = vld [vmem:[#allocation58_spill] sm:$0xff] }
  0xa0   :  { %496 = vmatpush.msrb.mxu0 %v3874_v44  ;;  %555 = vmatpush.msrb.mxu3 %v3877_v57  ;;  %v400_v44 = vld.sshfl [vmem:[#allocation1 + $0x20] sm:$0xff pattern:$0x73625140]  ;;  %v2377_v57 = vld.sshfl [vmem:[#allocation1 + $0x28] sm:$0xff pattern:$0x73625140] }
  0xa1   :  { %536 = vmatpush.msrb.mxu2 %v3876_v49  ;;  %516 = vmatpush.msrb.mxu1 %v3879_v43  ;;  %v403_v49 = vld.sshfl [vmem:[#allocation1 + $0x38] sm:$0xff pattern:$0x73625140]  ;;  %v3887_v43 = vld [vmem:[#allocation61_spill] sm:$0xff] }
  0xa2   :  { %497 = vmatpush.msrb.mxu0 %v3878_v41  ;;  %556 = vmatpush.msrb.mxu3 %v3881_v55  ;;  %v3886_v41 = vld [vmem:[#allocation59_spill] sm:$0xff]  ;;  %576 = vst [vmem:[#allocation1 + $0x20] ss:$4 sm:$0xff] %v2027_v53  ;;  %v3898_v53 = vld [vmem:[#allocation73_spill] sm:$0xff] }
  0xa3   :  { %537 = vmatpush.msrb.mxu2 %v3880_v63  ;;  %517 = vmatpush.msrb.mxu1 %v3883_v48  ;;  %v3888_v55 = vld [vmem:[#allocation63_spill] sm:$0xff]  ;;  %v3890_v48 = vld [vmem:[#allocation65_spill] sm:$0xff]  ;;  %v3891_v63 = vld [vmem:[#allocation66_spill] sm:$0xff] }
  0xa4   :  { %498 = vmatpush.msrb.mxu0 %v3882_v42  ;;  %557 = vmatpush.msrb.mxu3 %v3885_v39  ;;  %v3889_v42 = vld [vmem:[#allocation64_spill] sm:$0xff] }
  0xa5   :  { %538 = vmatpush.msrb.mxu2 %v3884_v38  ;;  %518 = vmatpush.msrb.mxu1 %v3887_v43  ;;  %v3892_v38 = vld [vmem:[#allocation67_spill] sm:$0xff]  ;;  %v3893_v39 = vld [vmem:[#allocation68_spill] sm:$0xff] }
  0xa6   :  { %499 = vmatpush.msrb.mxu0 %v3886_v41  ;;  %558 = vmatpush.msrb.mxu3 %v3889_v42  ;;  %v3896_v41 = vld [vmem:[#allocation71_spill] sm:$0xff]  ;;  %v3897_v43 = vld [vmem:[#allocation72_spill] sm:$0xff] }
  0xa7   :  { %539 = vmatpush.msrb.mxu2 %v3888_v55  ;;  %519 = vmatpush.msrb.mxu1 %v3891_v63  ;;  %v3899_v55 = vld [vmem:[#allocation74_spill] sm:$0xff]  ;;  %v3900_v42 = vld [vmem:[#allocation75_spill] sm:$0xff]  ;;  %v3902_v63 = vld [vmem:[#allocation77_spill] sm:$0xff] }
  0xa8   :  { %500 = vmatpush.msrb.mxu0 %v3890_v48  ;;  %559 = vmatpush.msrb.mxu3 %v3893_v39  ;;  %v3901_v48 = vld [vmem:[#allocation76_spill] sm:$0xff]  ;;  %v3904_v39 = vld [vmem:[#allocation79_spill] sm:$0xff] }
  0xa9   :  { %540 = vmatpush.msrb.mxu2 %v3892_v38  ;;  %520 = vmatpush.msrb.mxu1 %v3895_v54  ;;  %v3903_v38 = vld [vmem:[#allocation78_spill] sm:$0xff]  ;;  %v3906_v54 = vld [vmem:[#allocation81_spill] sm:$0xff] }
  0xaa   :  { %501 = vmatpush.msrb.mxu0 %v3894_v40  ;;  %560 = vmatpush.msrb.mxu3 %v3897_v43  ;;  %v3905_v40 = vld [vmem:[#allocation80_spill] sm:$0xff]  ;;  %v3908_v43 = vld [vmem:[#allocation83_spill] sm:$0xff] }
  0xab   :  { %541 = vmatpush.msrb.mxu2 %v3896_v41  ;;  %521 = vmatpush.msrb.mxu1 %v3899_v55  ;;  %v3907_v41 = vld [vmem:[#allocation82_spill] sm:$0xff] }
  0xac   :  { %502 = vmatpush.msrb.mxu0 %v3898_v53  ;;  %561 = vmatpush.msrb.mxu3 %v3901_v48  ;;  %v3909_v53 = vld [vmem:[#allocation84_spill] sm:$0xff] }
  0xad   :  { %542 = vmatpush.msrb.mxu2 %v3900_v42  ;;  %522 = vmatpush.msrb.mxu1 %v3903_v38 }
  0xae   :  { %503 = vmatpush.msrb.mxu0 %v3902_v63  ;;  %562 = vmatpush.msrb.mxu3 %v3905_v40  ;;  %v3911_v40 = vld [vmem:[#allocation88_spill] sm:$0xff] }
  0xaf   :  { %543 = vmatpush.msrb.mxu2 %v3904_v39  ;;  %523 = vmatpush.msrb.mxu1 %v3907_v41  ;;  %v3910_v39 = vld [vmem:[#allocation87_spill] sm:$0xff] }
  0xb0   :  { %504 = vmatpush.msrb.mxu0 %v3906_v54  ;;  %563 = vmatpush.msrb.mxu3 %v3909_v53  ;;  %v3912_v54 = vld [vmem:[#allocation89_spill] sm:$0xff]  ;;  %v3914_v53 = vld [vmem:[#allocation91_spill] sm:$0xff] }
  0xb1   :  { %544 = vmatpush.msrb.mxu2 %v3908_v43  ;;  %524 = vmatpush.msrb.mxu1 %v2176_v58  ;;  %v3913_v43 = vld [vmem:[#allocation90_spill] sm:$0xff]  ;;  %v3916_v58 = vld [vmem:[#allocation97_spill] sm:$0xff] }
  0xb2   :  { %505 = vmatpush.msrb.mxu0 %v2169_v60  ;;  %564 = vmatpush.msrb.mxu3 %v2186_v56  ;;  %v3915_v60 = vld [vmem:[#allocation96_spill] sm:$0xff] }
  0xb3   :  { %545 = vmatpush.msrb.mxu2 %v2181_v59  ;;  %525 = vmatpush.msrb.mxu1 %v3910_v39 }
  0xb4   :  { %506 = vmatpush.msrb.mxu0 %v2193_v50  ;;  %565 = vmatpush.msrb.mxu3 %v3912_v54 }
  0xb5   :  { %546 = vmatpush.msrb.mxu2 %v3911_v40  ;;  %526 = vmatpush.msrb.mxu1 %v3914_v53 }
  0xb6   :  { %468 = vmatmul.f32.vlgmr.msra.gmra.mxu2 %v2346_v51  ;;  %507 = vmatpush.msrb.mxu0 %v3913_v43  ;;  %v3952_v51 = vld [vmem:[#allocation36_spill] sm:$0xff] }
  0xb7   :  { %547 = vmatpush.msrb.mxu2 %v3915_v60  ;;  %566 = vmatpush.msrb.mxu3 %v3916_v58 }
  0xb8   :  { %428 = vmatmul.f32.vlgmr.msra.gmra.mxu0 %v2348_v61  ;;  %488 = vmatmul.f32.vlgmr.msra.gmra.mxu3 %v2352_v62  ;;  %v3953_v61 = vld [vmem:[#allocation60_spill] sm:$0xff] }
  0xb9   :  { %593 = vmatpush.msra.mxu0 %v1461_v0  ;;  %633 = vmatpush.msra.mxu2 %v1466_v1  ;;  %v3917_v0 = vld [vmem:[#allocation48_spill] sm:$0xff] }
  0xba   :  { %527 = vmatpush.msrb.mxu1 %v2252_v45  ;;  %567 = vmatpush.msrb.mxu3 %v2259_v52  ;;  %v3669_v1 = vsub.f32 1.0, %v3917_v0 }
  0xbb   :  { %448 = vmatmul.f32.vlgmr.msra.gmra.mxu1 %v2354_v47  ;;  %594 = vmatpush.msra.mxu0 %v1471_v2  ;;  %v3918_v2 = vld [vmem:[#allocation7_spill] sm:$0xff]  ;;  %v3949_v47 = vld [vmem:[#allocation33_spill] sm:$0xff] }
  0xbc   :  { %613 = vmatpush.msra.mxu1 %v1478_v3  ;;  %634 = vmatpush.msra.mxu2 %v1483_v4  ;;  %v3919_v3 = vld [vmem:[#allocation5_spill] sm:$0xff]  ;;  %v3920_v4 = vld [vmem:[#allocation8_spill] sm:$0xff] }
  0xbd   :  { %653 = vmatpush.msra.mxu3 %v1488_v5  ;;  %595 = vmatpush.msra.mxu0 %v1495_v6  ;;  %v3921_v5 = vld [vmem:[#allocation6_spill] sm:$0xff]  ;;  %v3922_v6 = vld [vmem:[#allocation11_spill] sm:$0xff] }
  0xbe   :  { %614 = vmatpush.msra.mxu1 %v1500_v7  ;;  %635 = vmatpush.msra.mxu2 %v1505_v8  ;;  %v3923_v7 = vld [vmem:[#allocation9_spill] sm:$0xff]  ;;  %v3924_v8 = vld [vmem:[#allocation12_spill] sm:$0xff] }
  0xbf   :  { %654 = vmatpush.msra.mxu3 %v1512_v9  ;;  %548 = vmatmul.f32.vlgmr.msrb.gmra.mxu2 %v402_v46  ;;  %v3925_v9 = vld [vmem:[#allocation10_spill] sm:$0xff]  ;;  %v3954_v46 = vsub.f32 1.0, %v3953_v61  ;;  %v3986_v61 = vld [vmem:[#allocation72_spill] sm:$0xff] }
  0xc0   :  { %596 = vmatpush.msra.mxu0 %v1524_v11  ;;  %615 = vmatpush.msra.mxu1 %v1517_v10  ;;  %v3926_v10 = vld [vmem:[#allocation45_spill] sm:$0xff] }
  0xc1   :  { %636 = vmatpush.msra.mxu2 %v1529_v12  ;;  %655 = vmatpush.msra.mxu3 %v1534_v13  ;;  %v3927_v11 = vsub.f32 1.0, %v3926_v10  ;;  %v3928_v13 = vld [vmem:[#allocation15_spill] sm:$0xff] }
  0xc2   :  { %508 = vmatmul.f32.vlgmr.msrb.gmra.mxu0 %v400_v44  ;;  %568 = vmatmul.f32.vlgmr.msrb.gmra.mxu3 %v403_v49  ;;  %v3948_v44 = vld [vmem:[#allocation32_spill] sm:$0xff]  ;;  %v3951_v49 = vld [vmem:[#allocation35_spill] sm:$0xff] }
  0xc3   :  { %597 = vmatpush.msra.mxu0 %v1553_v16  ;;  %616 = vmatpush.msra.mxu1 %v1541_v14  ;;  %v753_v12 = vmul.f32 %v3669_v1, %v3927_v11  ;;  %v3929_v14 = vld [vmem:[#allocation13_spill] sm:$0xff]  ;;  %v3931_v16 = vld [vmem:[#allocation14_spill] sm:$0xff]  ;;  %v3961_v10 = vld [vmem:[#allocation43_spill] sm:$0xff] }
  0xc4   :  { %637 = vmatpush.msra.mxu2 %v1558_v17  ;;  %656 = vmatpush.msra.mxu3 %v1546_v15  ;;  %v3930_v15 = vld [vmem:[#allocation16_spill] sm:$0xff]  ;;  %v3932_v17 = vld [vmem:[#allocation19_spill] sm:$0xff]  ;;  %v2834_v1 = vld [vmem:[%s3497_s2 + $0x1b0] sm:$0xff] }
  0xc5   :  { %528 = vmatmul.f32.vlgmr.msrb.gmra.mxu1 %v2377_v57  ;;  %598 = vmatpush.msra.mxu0 %v1577_v20  ;;  %v2482_v20 = vld.sshfl [vmem:[#allocation1] sm:$0xff pattern:$0x73625140]  ;;  %v3950_v57 = vld [vmem:[#allocation34_spill] sm:$0xff]  ;;  %v3962_v11 = vld [vmem:[#allocation44_spill] sm:$0xff]  ;;  %4005 = vst [vmem:[#allocation91_spill] sm:$0xff] %v2834_v1 }
  0xc6   :  { %617 = vmatpush.msra.mxu1 %v1565_v18  ;;  %638 = vmatpush.msra.mxu2 %v1582_v21  ;;  %v3933_v18 = vld [vmem:[#allocation17_spill] sm:$0xff]  ;;  %v3934_v21 = vld [vmem:[#allocation20_spill] sm:$0xff] }
  0xc7   :  { %657 = vmatpush.msra.mxu3 %v1570_v19  ;;  %599 = vmatpush.msra.mxu0 %v1601_v24  ;;  %v2480_v19 = vld.sshfl [vmem:[#allocation1 + $0x10] sm:$0xff pattern:$0x73625140]  ;;  %v2488_v24 = vld.sshfl [vmem:[#allocation1 + $0x8] sm:$0xff pattern:$0x73625140] }
  0xc8   :  { %618 = vmatpush.msra.mxu1 %v1589_v22  ;;  %639 = vmatpush.msra.mxu2 %v1606_v25  ;;  %v3935_v22 = vld [vmem:[#allocation18_spill] sm:$0xff]  ;;  %v3936_v25 = vld [vmem:[#allocation23_spill] sm:$0xff] }
  0xc9   :  { %658 = vmatpush.msra.mxu3 %v1594_v23  ;;  %600 = vmatpush.msra.mxu0 %v1625_v28  ;;  %v2486_v23 = vld.sshfl [vmem:[#allocation1 + $0x18] sm:$0xff pattern:$0x73625140] }
  0xca   :  { %619 = vmatpush.msra.mxu1 %v1613_v26  ;;  %640 = vmatpush.msra.mxu2 %v1630_v29  ;;  %v3937_v26 = vld [vmem:[#allocation21_spill] sm:$0xff]  ;;  %757 = vst [vmem:[#allocation1] ss:$4 sm:$0xff] %v753_v12  ;;  %v3939_v28 = vld [vmem:[#allocation22_spill] sm:$0xff]  ;;  %v3940_v29 = vld [vmem:[#allocation27_spill] sm:$0xff] }
  0xcb   :  { %659 = vmatpush.msra.mxu3 %v1618_v27  ;;  %601 = vmatpush.msra.mxu0 %v1649_v32  ;;  %v3938_v27 = vld [vmem:[#allocation24_spill] sm:$0xff]  ;;  %v3943_v32 = vld [vmem:[#allocation26_spill] sm:$0xff] }
  0xcc   :  { %620 = vmatpush.msra.mxu1 %v1637_v30  ;;  %641 = vmatpush.msra.mxu2 %v1654_v33  ;;  %v3941_v30 = vld [vmem:[#allocation25_spill] sm:$0xff]  ;;  %v3944_v33 = vld [vmem:[#allocation62_spill] sm:$0xff] }
  0xcd   :  { %660 = vmatpush.msra.mxu3 %v1642_v31  ;;  %602 = vmatpush.msra.mxu0 %v1673_v36  ;;  %v3942_v31 = vld [vmem:[#allocation28_spill] sm:$0xff]  ;;  %v3946_v36 = vld [vmem:[#allocation30_spill] sm:$0xff] }
  0xce   :  { %621 = vmatpush.msra.mxu1 %v1661_v34  ;;  %642 = vmatpush.msra.mxu2 %v1678_v37  ;;  %v3668_v34 = vsub.f32 1.0, %v3944_v33  ;;  %v3947_v37 = vld [vmem:[#allocation31_spill] sm:$0xff]  ;;  %v2523_v12 = vld.sshfl [vmem:[#allocation1 + $0x38] sm:$0xff pattern:$0x73625140] }
  0xcf   :  { %661 = vmatpush.msra.mxu3 %v1666_v35  ;;  %603 = vmatpush.msra.mxu0 %v3918_v2  ;;  %v3945_v35 = vld [vmem:[#allocation29_spill] sm:$0xff] }
  0xd0   :  { %622 = vmatpush.msra.mxu1 %v3919_v3  ;;  %643 = vmatpush.msra.mxu2 %v3920_v4  ;;  %v754_v62 = vmul.f32 %v3668_v34, %v3954_v46  ;;  %v3955_v2 = vld [vmem:[#allocation37_spill] sm:$0xff]  ;;  %v3956_v3 = vld [vmem:[#allocation38_spill] sm:$0xff]  ;;  %v3957_v4 = vld [vmem:[#allocation39_spill] sm:$0xff] }
  0xd1   :  { %662 = vmatpush.msra.mxu3 %v3921_v5  ;;  %604 = vmatpush.msra.mxu0 %v3922_v6  ;;  %v3958_v5 = vld [vmem:[#allocation40_spill] sm:$0xff]  ;;  %v3959_v6 = vld [vmem:[#allocation41_spill] sm:$0xff] }
  0xd2   :  { %623 = vmatpush.msra.mxu1 %v3923_v7  ;;  %644 = vmatpush.msra.mxu2 %v3924_v8  ;;  %v3960_v7 = vld [vmem:[#allocation42_spill] sm:$0xff]  ;;  %v2517_v8 = vld.sshfl [vmem:[#allocation1 + $0x30] sm:$0xff pattern:$0x73625140]  ;;  %v2828_v34 = vld [vmem:[%s3497_s2 + $0x128] sm:$0xff] }
  0xd3   :  { %663 = vmatpush.msra.mxu3 %v3925_v9  ;;  %605 = vmatpush.msra.mxu0 %v3928_v13  ;;  %v2519_v9 = vld.sshfl [vmem:[#allocation1 + $0x20] sm:$0xff pattern:$0x73625140]  ;;  %v2525_v13 = vld.sshfl [vmem:[#allocation1 + $0x28] sm:$0xff pattern:$0x73625140] }
  0xd4   :  { %624 = vmatpush.msra.mxu1 %v3929_v14  ;;  %645 = vmatpush.msra.mxu2 %v3930_v15  ;;  %v3963_v14 = vld [vmem:[#allocation46_spill] sm:$0xff]  ;;  %v3964_v15 = vld [vmem:[#allocation47_spill] sm:$0xff]  ;;  %759 = vst [vmem:[#allocation1 + $0x20] ss:$4 sm:$0xff] %v754_v62  ;;  %v3987_v46 = vld [vmem:[#allocation73_spill] sm:$0xff] }
  0xd5   :  { %664 = vmatpush.msra.mxu3 %v3931_v16  ;;  %606 = vmatpush.msra.mxu0 %v3932_v17  ;;  %v3965_v16 = vld [vmem:[#allocation49_spill] sm:$0xff]  ;;  %v3966_v17 = vld [vmem:[#allocation50_spill] sm:$0xff]  ;;  %4004 = vst [vmem:[#allocation90_spill] sm:$0xff] %v2828_v34 }
  0xd6   :  { %625 = vmatpush.msra.mxu1 %v3933_v18  ;;  %646 = vmatpush.msra.mxu2 %v3934_v21  ;;  %v3967_v18 = vld [vmem:[#allocation51_spill] sm:$0xff]  ;;  %v3968_v21 = vld [vmem:[#allocation52_spill] sm:$0xff] }
  0xd7   :  { %665 = vmatpush.msra.mxu3 %v3935_v22  ;;  %607 = vmatpush.msra.mxu0 %v3936_v25  ;;  %v3969_v22 = vld [vmem:[#allocation53_spill] sm:$0xff]  ;;  %v3970_v25 = vld [vmem:[#allocation54_spill] sm:$0xff] }
  0xd8   :  { %626 = vmatpush.msra.mxu1 %v3937_v26  ;;  %647 = vmatpush.msra.mxu2 %v3938_v27  ;;  %v3971_v26 = vld [vmem:[#allocation55_spill] sm:$0xff]  ;;  %v3972_v27 = vld [vmem:[#allocation56_spill] sm:$0xff] }
  0xd9   :  { %666 = vmatpush.msra.mxu3 %v3939_v28  ;;  %608 = vmatpush.msra.mxu0 %v3940_v29  ;;  %v3973_v28 = vld [vmem:[#allocation57_spill] sm:$0xff]  ;;  %v3974_v29 = vld [vmem:[#allocation58_spill] sm:$0xff] }
  0xda   :  { %627 = vmatpush.msra.mxu1 %v3941_v30  ;;  %648 = vmatpush.msra.mxu2 %v3942_v31  ;;  %v3975_v30 = vld [vmem:[#allocation59_spill] sm:$0xff]  ;;  %v3976_v31 = vld [vmem:[#allocation61_spill] sm:$0xff] }
  0xdb   :  { %667 = vmatpush.msra.mxu3 %v3943_v32  ;;  %673 = vmatpush.msrb.mxu0 %v3945_v35  ;;  %v3977_v32 = vld [vmem:[#allocation63_spill] sm:$0xff]  ;;  %v3978_v35 = vld [vmem:[#allocation64_spill] sm:$0xff] }
  0xdc   :  { %713 = vmatpush.msrb.mxu2 %v3946_v36  ;;  %628 = vmatpush.msra.mxu1 %v3947_v37  ;;  %v3979_v36 = vld [vmem:[#allocation65_spill] sm:$0xff]  ;;  %v3980_v37 = vld [vmem:[#allocation66_spill] sm:$0xff] }
  0xdd   :  { %668 = vmatpush.msra.mxu3 %v3948_v44  ;;  %674 = vmatpush.msrb.mxu0 %v3949_v47  ;;  %v3981_v44 = vld [vmem:[#allocation67_spill] sm:$0xff]  ;;  %v3982_v47 = vld [vmem:[#allocation68_spill] sm:$0xff] }
  0xde   :  { %693 = vmatpush.msrb.mxu1 %v3950_v57  ;;  %714 = vmatpush.msrb.mxu2 %v3951_v49  ;;  %v3983_v57 = vld [vmem:[#allocation69_spill] sm:$0xff]  ;;  %v3984_v49 = vld [vmem:[#allocation70_spill] sm:$0xff] }
  0xdf   :  { %733 = vmatpush.msrb.mxu3 %v3952_v51  ;;  %675 = vmatpush.msrb.mxu0 %v3955_v2  ;;  %v3985_v51 = vld [vmem:[#allocation71_spill] sm:$0xff] }
  0xe0   :  { %694 = vmatpush.msrb.mxu1 %v3956_v3  ;;  %715 = vmatpush.msrb.mxu2 %v3957_v4  ;;  %v3988_v2 = vld [vmem:[#allocation79_spill] sm:$0xff]  ;;  %v3989_v4 = vld [vmem:[#allocation80_spill] sm:$0xff] }
  0xe1   :  { %734 = vmatpush.msrb.mxu3 %v3958_v5  ;;  %676 = vmatpush.msrb.mxu0 %v3959_v6 }
  0xe2   :  { %695 = vmatpush.msrb.mxu1 %v3960_v7  ;;  %716 = vmatpush.msrb.mxu2 %v3961_v10 }
  0xe3   :  { %735 = vmatpush.msrb.mxu3 %v3962_v11  ;;  %677 = vmatpush.msrb.mxu0 %v3963_v14  ;;  %v2583_v11 = vld [vmem:[%s3497_s2 + $0x78] sm:$0xff] }
  0xe4   :  { %696 = vmatpush.msrb.mxu1 %v3964_v15  ;;  %717 = vmatpush.msrb.mxu2 %v3965_v16  ;;  %v2589_v14 = vld [vmem:[%s3497_s2 + $0x178] sm:$0xff]  ;;  %v2599_v16 = vld [vmem:[%s3497_s2 + $0x70] sm:$0xff] }
  0xe5   :  { %736 = vmatpush.msrb.mxu3 %v3966_v17  ;;  %678 = vmatpush.msrb.mxu0 %v3967_v18  ;;  %v2605_v17 = vld [vmem:[%s3497_s2 + $0xf8] sm:$0xff] }
  0xe6   :  { %697 = vmatpush.msrb.mxu1 %v3968_v21  ;;  %718 = vmatpush.msrb.mxu2 %v3969_v22  ;;  %v2617_v18 = vld [vmem:[%s3497_s2 + $0x1f8] sm:$0xff]  ;;  %v2624_v22 = vld [vmem:[%s3497_s2 + $0x68] sm:$0xff] }
  0xe7   :  { %737 = vmatpush.msrb.mxu3 %v3970_v25  ;;  %679 = vmatpush.msrb.mxu0 %v3971_v26  ;;  %v2630_v25 = vld [vmem:[%s3497_s2 + $0xf0] sm:$0xff]  ;;  %v2636_v26 = vld [vmem:[%s3497_s2 + $0x168] sm:$0xff] }
  0xe8   :  { %698 = vmatpush.msrb.mxu1 %v3972_v27  ;;  %719 = vmatpush.msrb.mxu2 %v3973_v28  ;;  %v2648_v27 = vld [vmem:[%s3497_s2 + $0x60] sm:$0xff]  ;;  %v2654_v28 = vld [vmem:[%s3497_s2 + $0xe8] sm:$0xff] }
  0xe9   :  { %738 = vmatpush.msrb.mxu3 %v3974_v29  ;;  %680 = vmatpush.msrb.mxu0 %v3975_v30  ;;  %v2660_v30 = vld [vmem:[%s3497_s2 + $0x160] sm:$0xff] }
  0xea   :  { %699 = vmatpush.msrb.mxu1 %v3976_v31  ;;  %720 = vmatpush.msrb.mxu2 %v3977_v32  ;;  %v2666_v31 = vld [vmem:[%s3497_s2 + $0x1e8] sm:$0xff]  ;;  %v2672_v32 = vld [vmem:[%s3497_s2 + $0x58] sm:$0xff] }
  0xeb   :  { %739 = vmatpush.msrb.mxu3 %v3978_v35  ;;  %681 = vmatpush.msrb.mxu0 %v3979_v36  ;;  %v2678_v35 = vld [vmem:[%s3497_s2 + $0xe0] sm:$0xff]  ;;  %v2684_v36 = vld [vmem:[%s3497_s2 + $0x158] sm:$0xff] }
  0xec   :  { %700 = vmatpush.msrb.mxu1 %v3980_v37  ;;  %721 = vmatpush.msrb.mxu2 %v3981_v44  ;;  %v2690_v37 = vld [vmem:[%s3497_s2 + $0x1e0] sm:$0xff]  ;;  %v2696_v44 = vld [vmem:[%s3497_s2 + $0x50] sm:$0xff] }
  0xed   :  { %740 = vmatpush.msrb.mxu3 %v3982_v47  ;;  %682 = vmatpush.msrb.mxu0 %v3983_v57  ;;  %v2702_v47 = vld [vmem:[%s3497_s2 + $0xd8] sm:$0xff]  ;;  %v2708_v57 = vld [vmem:[%s3497_s2 + $0x150] sm:$0xff] }
  0xee   :  { %701 = vmatpush.msrb.mxu1 %v3984_v49  ;;  %722 = vmatpush.msrb.mxu2 %v3985_v51  ;;  %v2714_v49 = vld [vmem:[%s3497_s2 + $0x1d8] sm:$0xff]  ;;  %v2720_v51 = vld [vmem:[%s3497_s2 + $0x48] sm:$0xff] }
  0xef   :  { %741 = vmatpush.msrb.mxu3 %v3986_v61  ;;  %683 = vmatpush.msrb.mxu0 %v3987_v46  ;;  %v2726_v61 = vld [vmem:[%s3497_s2 + $0xd0] sm:$0xff]  ;;  %v2732_v46 = vld [vmem:[%s3497_s2 + $0x148] sm:$0xff] }
  0xf0   :  { %702 = vmatpush.msrb.mxu1 %v3899_v55  ;;  %723 = vmatpush.msrb.mxu2 %v3900_v42  ;;  %v3990_v55 = vld [vmem:[#allocation81_spill] sm:$0xff] }
  0xf1   :  { %742 = vmatpush.msrb.mxu3 %v3901_v48  ;;  %649 = vmatmul.f32.vlgmr.msra.gmra.mxu2 %v2480_v19  ;;  %v3991_v48 = vld [vmem:[#allocation83_spill] sm:$0xff]  ;;  %v3994_v19 = vld [vmem:[#allocation86_spill] sm:$0xff] }
  0xf2   :  { %684 = vmatpush.msrb.mxu0 %v3902_v63  ;;  %v246_v62 = vpop.f32.mrf.mxu0  ;;  %703 = vmatpush.msrb.mxu1 %v3903_v38  ;;  %v3992_v63 = vld [vmem:[#allocation84_spill] sm:$0xff]  ;;  %v3993_v38 = vld [vmem:[#allocation85_spill] sm:$0xff] }
  0xf3   :  { %724 = vmatpush.msrb.mxu2 %v3988_v2  ;;  %v266_v3 = vpop.f32.mrf.mxu1  ;;  %743 = vmatpush.msrb.mxu3 %v3989_v4 }
  0xf4   :  { %609 = vmatmul.f32.vlgmr.msra.gmra.mxu0 %v2482_v20  ;;  %669 = vmatmul.f32.vlgmr.msra.gmra.mxu3 %v2486_v23  ;;  %v267_v42 = vadd.f32 %v266_v3, %v246_v62  ;;  %v2738_v62 = vld [vmem:[%s3497_s2 + $0x1d0] sm:$0xff] }
  0xf5   :  { %685 = vmatpush.msrb.mxu0 %v3990_v55  ;;  %704 = vmatpush.msrb.mxu1 %v3907_v41 }
  0xf6   :  { %725 = vmatpush.msrb.mxu2 %v3991_v48  ;;  %744 = vmatpush.msrb.mxu3 %v3992_v63 }
  0xf7   :  { %629 = vmatmul.f32.vlgmr.msra.gmra.mxu1 %v2488_v24  ;;  %686 = vmatpush.msrb.mxu0 %v3993_v38  ;;  %v286_v5 = vpop.f32.mrf.mxu2 }
  0xf8   :  { %705 = vmatpush.msrb.mxu1 %v3994_v19  ;;  %726 = vmatpush.msrb.mxu2 %v2181_v59  ;;  %v287_v20 = vadd.f32 %v286_v5, %v267_v42  ;;  %v306_v23 = vpop.f32.mrf.mxu3  ;;  %v2744_v42 = vld [vmem:[%s3497_s2 + $0x40] sm:$0xff]  ;;  %v2750_v5 = vld [vmem:[%s3497_s2 + $0xc8] sm:$0xff] }
  0xf9   :  { %745 = vmatpush.msrb.mxu3 %v2186_v56  ;;  %687 = vmatpush.msrb.mxu0 %v2193_v50 }
  0xfa   :  { %706 = vmatpush.msrb.mxu1 %v3910_v39  ;;  %v326_v6 = vpop.f32.mrf.mxu0  ;;  %727 = vmatpush.msrb.mxu2 %v3911_v40  ;;  %v307_v24 = vadd.f32 %v306_v23, %v287_v20  ;;  %v2756_v20 = vld [vmem:[%s3497_s2 + $0x140] sm:$0xff]  ;;  %v2762_v23 = vld [vmem:[%s3497_s2 + $0x1c8] sm:$0xff] }
  0xfb   :  { %746 = vmatpush.msrb.mxu3 %v3912_v54  ;;  %688 = vmatpush.msrb.mxu0 %v3913_v43  ;;  %v346_v7 = vpop.f32.mrf.mxu1 }
  0xfc   :  { %707 = vmatpush.msrb.mxu1 %v3914_v53  ;;  %728 = vmatpush.msrb.mxu2 %v3915_v60  ;;  %v327_v10 = vadd.f32 %v326_v6, %v307_v24  ;;  %v2768_v6 = vld [vmem:[%s3497_s2 + $0x38] sm:$0xff]  ;;  %v2774_v24 = vld [vmem:[%s3497_s2 + $0xc0] sm:$0xff] }
  0xfd   :  { %747 = vmatpush.msrb.mxu3 %v3916_v58  ;;  %729 = vmatmul.f32.vlgmr.msrb.gmra.mxu2 %v2517_v8  ;;  %3995 = vst [vmem:[#allocation74_spill] sm:$0xff] %v2774_v24 }
  0xfe   :  { %776 = vmatpush.msra.mxu0 %v2583_v11  ;;  %816 = vmatpush.msra.mxu2 %v2589_v14  ;;  %v347_v15 = vadd.f32 %v346_v7, %v327_v10  ;;  %v2780_v7 = vld [vmem:[%s3497_s2 + $0x138] sm:$0xff]  ;;  %v2786_v10 = vld [vmem:[%s3497_s2 + $0x1c0] sm:$0xff] }
  0xff   :  { %689 = vmatmul.f32.vlgmr.msrb.gmra.mxu0 %v2519_v9  ;;  %708 = vmatpush.msrb.mxu1 %v2252_v45  ;;  %v366_v8 = vpop.f32.mrf.mxu2  ;;  %v2611_v9 = vld [vmem:[%s3497_s2 + $0x170] sm:$0xff]  ;;  %3996 = vst [vmem:[#allocation75_spill] sm:$0xff] %v2780_v7 }
 0x100   :  { %748 = vmatpush.msrb.mxu3 %v2259_v52  ;;  %777 = vmatpush.msra.mxu0 %v2599_v16  ;;  %v386_v21 = vpop.f32.mrf.mxu3  ;;  %3997 = vst [vmem:[#allocation76_spill] sm:$0xff] %v2786_v10 }
 0x101   :  { %749 = vmatmul.f32.vlgmr.msrb.gmra.mxu3 %v2523_v12  ;;  %796 = vmatpush.msra.mxu1 %v2605_v17  ;;  %v367_v12 = vadd.f32 %v366_v8, %v347_v15  ;;  %v2792_v15 = vld [vmem:[%s3497_s2 + $0x30] sm:$0xff]  ;;  %v2798_v8 = vld [vmem:[%s3497_s2 + $0xb8] sm:$0xff] }
 0x102   :  { %817 = vmatpush.msra.mxu2 %v2611_v9  ;;  %836 = vmatpush.msra.mxu3 %v2617_v18  ;;  %3998 = vst [vmem:[#allocation77_spill] sm:$0xff] %v2792_v15 }
 0x103   :  { %709 = vmatmul.f32.vlgmr.msrb.gmra.mxu1 %v2525_v13  ;;  %778 = vmatpush.msra.mxu0 %v2624_v22  ;;  %v2642_v13 = vld [vmem:[%s3497_s2 + $0x1f0] sm:$0xff]  ;;  %v387_v29 = vadd.f32 %v386_v21, %v367_v12  ;;  %3999 = vst [vmem:[#allocation78_spill] sm:$0xff] %v2798_v8  ;;  %v2810_v21 = vld [vmem:[%s3497_s2 + $0x1b8] sm:$0xff] }
 0x104   :  { %797 = vmatpush.msra.mxu1 %v2630_v25  ;;  %818 = vmatpush.msra.mxu2 %v2636_v26  ;;  %v2804_v12 = vld [vmem:[%s3497_s2 + $0x130] sm:$0xff]  ;;  %4001 = vst [vmem:[#allocation87_spill] sm:$0xff] %v2810_v21 }
 0x105   :  { %837 = vmatpush.msra.mxu3 %v2642_v13  ;;  %779 = vmatpush.msra.mxu0 %v2648_v27  ;;  %vm1151_vm2 = vcmp.gt.f32.partialorder %v387_v29, 0.0  ;;  %4000 = vst [vmem:[#allocation82_spill] sm:$0xff] %v2804_v12 }
 0x106   :  { %798 = vmatpush.msra.mxu1 %v2654_v28  ;;  %819 = vmatpush.msra.mxu2 %v2660_v30  ;;  %v1152_v3 = vsel %vm1151_vm2, %v387_v29, 1.0  ;;  %v2816_v29 = vld [vmem:[%s3497_s2 + $0x28] sm:$0xff] }
 0x107   :  { %838 = vmatpush.msra.mxu3 %v2666_v31  ;;  %780 = vmatpush.msra.mxu0 %v2672_v32  ;;  %4002 = vst [vmem:[#allocation88_spill] sm:$0xff] %v2816_v29 }
 0x108   :  { %799 = vmatpush.msra.mxu1 %v2678_v35  ;;  %820 = vmatpush.msra.mxu2 %v2684_v36 }
 0x109   :  { %839 = vmatpush.msra.mxu3 %v2690_v37  ;;  %781 = vmatpush.msra.mxu0 %v2696_v44 }
 0x10a   :  { %800 = vmatpush.msra.mxu1 %v2702_v47  ;;  %821 = vmatpush.msra.mxu2 %v2708_v57 }
 0x10b   :  { %840 = vmatpush.msra.mxu3 %v2714_v49  ;;  %782 = vmatpush.msra.mxu0 %v2720_v51 }
 0x10c   :  { %801 = vmatpush.msra.mxu1 %v2726_v61  ;;  %822 = vmatpush.msra.mxu2 %v2732_v46 }
 0x10d   :  { %841 = vmatpush.msra.mxu3 %v2738_v62  ;;  %783 = vmatpush.msra.mxu0 %v2744_v42 }
 0x10e   :  { %802 = vmatpush.msra.mxu1 %v2750_v5  ;;  %823 = vmatpush.msra.mxu2 %v2756_v20 }
 0x10f   :  { %842 = vmatpush.msra.mxu3 %v2762_v23  ;;  %1154 = vrot.lane.b32.xlu0 %v1152_v3, %s1435_s29  ;;  %v2822_v3 = vld [vmem:[%s3497_s2 + $0xb0] sm:$0xff] }
 0x110   :  { %784 = vmatpush.msra.mxu0 %v2768_v6  ;;  %803 = vmatpush.msra.mxu1 %v2774_v24  ;;  %4003 = vst [vmem:[#allocation89_spill] sm:$0xff] %v2822_v3  ;;  %v3154_v24 = vld [vmem:[%s3497_s2 + $0x2c8] sm:$0xff] }
 0x111   :  { %824 = vmatpush.msra.mxu2 %v2780_v7  ;;  %843 = vmatpush.msra.mxu3 %v2786_v10  ;;  %v3133_v10 = vld.sshfl [vmem:[#allocation1 + $0x38] sm:$0xff pattern:$0x73625140]  ;;  %v3140_v7 = vld [vmem:[%s3497_s2 + $0x3d0] sm:$0xff] }
 0x112   :  { %785 = vmatpush.msra.mxu0 %v2792_v15  ;;  %804 = vmatpush.msra.mxu1 %v2798_v8  ;;  %v3010_v8 = vld [vmem:[%s3497_s2 + $0x3f8] sm:$0xff]  ;;  %v3024_v15 = vld [vmem:[%s3497_s2 + $0x2f0] sm:$0xff]  ;;  %4054 = vst [vmem:[#allocation47_spill] sm:$0xff] %v3140_v7 }
 0x113   :  { %825 = vmatpush.msra.mxu2 %v2804_v12  ;;  %844 = vmatpush.msra.mxu3 %v2810_v21  ;;  %v2989_v21 = vld.sshfl [vmem:[#allocation1] sm:$0xff pattern:$0x73625140]  ;;  %v3003_v12 = vld.sshfl [vmem:[#allocation1 + $0x18] sm:$0xff pattern:$0x73625140] }
 0x114   :  { %786 = vmatpush.msra.mxu0 %v2816_v29  ;;  %805 = vmatpush.msra.mxu1 %v2822_v3  ;;  %v2840_v29 = vld [vmem:[%s3497_s2 + $0x20] sm:$0xff]  ;;  %v2846_v3 = vld [vmem:[%s3497_s2 + $0xa8] sm:$0xff]  ;;  %4033 = vst [vmem:[#allocation26_spill] sm:$0xff] %v3010_v8 }
 0x115   :  { %826 = vmatpush.msra.mxu2 %v2828_v34  ;;  %845 = vmatpush.msra.mxu3 %v2834_v1  ;;  %4006 = vst [vmem:[#allocation96_spill] sm:$0xff] %v2840_v29  ;;  %v2852_v34 = vld [vmem:[%s3497_s2 + $0x120] sm:$0xff]  ;;  %v2858_v1 = vld [vmem:[%s3497_s2 + $0x1a8] sm:$0xff] }
 0x116   :  { %787 = vmatpush.msra.mxu0 %v2840_v29  ;;  %4007 = vst [vmem:[#allocation97_spill] sm:$0xff] %v2846_v3  ;;  %806 = vmatpush.msra.mxu1 %v2846_v3  ;;  %v2864_v29 = vld [vmem:[%s3497_s2 + $0x18] sm:$0xff]  ;;  %v2870_v3 = vld [vmem:[%s3497_s2 + $0xa0] sm:$0xff] }
 0x117   :  { %4008 = vst [vmem:[#allocation48_spill] sm:$0xff] %v2852_v34  ;;  %827 = vmatpush.msra.mxu2 %v2852_v34  ;;  %846 = vmatpush.msra.mxu3 %v2858_v1  ;;  %v2876_v34 = vld [vmem:[%s3497_s2 + $0x118] sm:$0xff] }
 0x118   :  { %4009 = vst [vmem:[#allocation7_spill] sm:$0xff] %v2858_v1  ;;  %788 = vmatpush.msra.mxu0 %v2864_v29  ;;  %807 = vmatpush.msra.mxu1 %v2870_v3  ;;  %v2882_v1 = vld [vmem:[%s3497_s2 + $0x1a0] sm:$0xff] }
 0x119   :  { %4010 = vst [vmem:[#allocation5_spill] sm:$0xff] %v2864_v29  ;;  %828 = vmatpush.msra.mxu2 %v2876_v34  ;;  %847 = vmatpush.msra.mxu3 %v2882_v1  ;;  %v2888_v29 = vld [vmem:[%s3497_s2 + $0x10] sm:$0xff] }
 0x11a   :  { %4011 = vst [vmem:[#allocation8_spill] sm:$0xff] %v2870_v3  ;;  %789 = vmatpush.msra.mxu0 %v2888_v29  ;;  %v2894_v3 = vld [vmem:[%s3497_s2 + $0x98] sm:$0xff] }
 0x11b   :  { %4012 = vst [vmem:[#allocation6_spill] sm:$0xff] %v2876_v34  ;;  %808 = vmatpush.msra.mxu1 %v2894_v3  ;;  %v2900_v34 = vld [vmem:[%s3497_s2 + $0x110] sm:$0xff] }
 0x11c   :  { %4013 = vst [vmem:[#allocation11_spill] sm:$0xff] %v2882_v1  ;;  %829 = vmatpush.msra.mxu2 %v2900_v34  ;;  %v2906_v1 = vld [vmem:[%s3497_s2 + $0x198] sm:$0xff] }
 0x11d   :  { %4014 = vst [vmem:[#allocation9_spill] sm:$0xff] %v2888_v29  ;;  %848 = vmatpush.msra.mxu3 %v2906_v1  ;;  %v2912_v29 = vld [vmem:[%s3497_s2 + $0x8] sm:$0xff] }
 0x11e   :  { %4015 = vst [vmem:[#allocation12_spill] sm:$0xff] %v2894_v3  ;;  %790 = vmatpush.msra.mxu0 %v2912_v29  ;;  %v2918_v3 = vld [vmem:[%s3497_s2 + $0x90] sm:$0xff] }
 0x11f   :  { %4016 = vst [vmem:[#allocation10_spill] sm:$0xff] %v2900_v34  ;;  %809 = vmatpush.msra.mxu1 %v2918_v3  ;;  %v2924_v34 = vld [vmem:[%s3497_s2 + $0x108] sm:$0xff] }
 0x120   :  { %4017 = vst [vmem:[#allocation45_spill] sm:$0xff] %v2906_v1  ;;  %830 = vmatpush.msra.mxu2 %v2924_v34  ;;  %v2930_v1 = vld [vmem:[%s3497_s2 + $0x190] sm:$0xff] }
 0x121   :  { %4018 = vst [vmem:[#allocation15_spill] sm:$0xff] %v2912_v29  ;;  %849 = vmatpush.msra.mxu3 %v2930_v1  ;;  %v2936_v29 = vld [vmem:[%s3497_s2] sm:$0xff] }
 0x122   :  { %4019 = vst [vmem:[#allocation13_spill] sm:$0xff] %v2918_v3  ;;  %791 = vmatpush.msra.mxu0 %v2936_v29  ;;  %v2942_v3 = vld [vmem:[%s3497_s2 + $0x88] sm:$0xff] }
 0x123   :  { %4020 = vst [vmem:[#allocation16_spill] sm:$0xff] %v2924_v34  ;;  %810 = vmatpush.msra.mxu1 %v2942_v3  ;;  %v2948_v34 = vld [vmem:[%s3497_s2 + $0x100] sm:$0xff]  ;;  %792 = vmatmul.f32.vlgmr.msra.gmra.mxu0 %v2989_v21 }
 0x124   :  { %4021 = vst [vmem:[#allocation14_spill] sm:$0xff] %v2930_v1  ;;  %831 = vmatpush.msra.mxu2 %v2948_v34  ;;  %v2954_v1 = vld [vmem:[%s3497_s2 + $0x188] sm:$0xff] }
 0x125   :  { %4022 = vst [vmem:[#allocation19_spill] sm:$0xff] %v2936_v29  ;;  %850 = vmatpush.msra.mxu3 %v2954_v1  ;;  %v2960_v29 = vld [vmem:[%s3497_s2 + $0x278] sm:$0xff] }
 0x126   :  { %4023 = vst [vmem:[#allocation17_spill] sm:$0xff] %v2942_v3  ;;  %856 = vmatpush.msrb.mxu0 %v2960_v29  ;;  %v2966_v3 = vld [vmem:[%s3497_s2 + $0x378] sm:$0xff] }
 0x127   :  { %4024 = vst [vmem:[#allocation20_spill] sm:$0xff] %v2948_v34  ;;  %896 = vmatpush.msrb.mxu2 %v2966_v3  ;;  %v2972_v34 = vld [vmem:[%s3497_s2 + $0x80] sm:$0xff] }
 0x128   :  { %4025 = vst [vmem:[#allocation18_spill] sm:$0xff] %v2954_v1  ;;  %811 = vmatpush.msra.mxu1 %v2972_v34  ;;  %v2978_v1 = vld [vmem:[%s3497_s2 + $0x180] sm:$0xff] }
 0x129   :  { %4026 = vst [vmem:[#allocation23_spill] sm:$0xff] %v2960_v29  ;;  %851 = vmatpush.msra.mxu3 %v2978_v1  ;;  %v2984_v29 = vld [vmem:[%s3497_s2 + $0x270] sm:$0xff] }
 0x12a   :  { %4027 = vst [vmem:[#allocation21_spill] sm:$0xff] %v2966_v3  ;;  %857 = vmatpush.msrb.mxu0 %v2984_v29  ;;  %v2987_v3 = vld.sshfl [vmem:[#allocation1 + $0x10] sm:$0xff pattern:$0x73625140]  ;;  %852 = vmatmul.f32.vlgmr.msra.gmra.mxu3 %v3003_v12 }
 0x12b   :  { %4028 = vst [vmem:[#allocation24_spill] sm:$0xff] %v2972_v34  ;;  %v2994_v34 = vld [vmem:[%s3497_s2 + $0x2f8] sm:$0xff]  ;;  %916 = vmatpush.msrb.mxu3 %v3010_v8  ;;  %v3030_v8 = vld [vmem:[%s3497_s2 + $0x368] sm:$0xff]  ;;  %832 = vmatmul.f32.vlgmr.msra.gmra.mxu2 %v2987_v3 }
 0x12c   :  { %4029 = vst [vmem:[#allocation22_spill] sm:$0xff] %v2978_v1  ;;  %876 = vmatpush.msrb.mxu1 %v2994_v34  ;;  %v3000_v1 = vld [vmem:[%s3497_s2 + $0x370] sm:$0xff] }
 0x12d   :  { %4030 = vst [vmem:[#allocation27_spill] sm:$0xff] %v2984_v29  ;;  %897 = vmatpush.msrb.mxu2 %v3000_v1  ;;  %v3005_v29 = vld.sshfl [vmem:[#allocation1 + $0x8] sm:$0xff pattern:$0x73625140] }
 0x12e   :  { %4031 = vst [vmem:[#allocation25_spill] sm:$0xff] %v2994_v34  ;;  %v3016_v34 = vld [vmem:[%s3497_s2 + $0x268] sm:$0xff]  ;;  %877 = vmatpush.msrb.mxu1 %v3024_v15 }
 0x12f   :  { %4032 = vst [vmem:[#allocation28_spill] sm:$0xff] %v3000_v1  ;;  %858 = vmatpush.msrb.mxu0 %v3016_v34  ;;  %v4035_v1 = vsub.f32 1.0, %v3917_v0  ;;  %898 = vmatpush.msrb.mxu2 %v3030_v8  ;;  %v3042_v0 = vld [vmem:[%s3497_s2 + $0x260] sm:$0xff] }
 0x130   :  { %4034 = vst [vmem:[#allocation62_spill] sm:$0xff] %v3016_v34  ;;  %v3036_v34 = vld [vmem:[%s3497_s2 + $0x3f0] sm:$0xff]  ;;  %812 = vmatmul.f32.vlgmr.msra.gmra.mxu1 %v3005_v29 }
 0x131   :  { %938 = vst [vmem:[#allocation1] ss:$4 sm:$0xff] %v4035_v1  ;;  %917 = vmatpush.msrb.mxu3 %v3036_v34  ;;  %859 = vmatpush.msrb.mxu0 %v3042_v0  ;;  %v3048_v1 = vld [vmem:[%s3497_s2 + $0x2e8] sm:$0xff] }
 0x132   :  { %4036 = vst [vmem:[#allocation29_spill] sm:$0xff] %v3024_v15  ;;  %878 = vmatpush.msrb.mxu1 %v3048_v1  ;;  %v3119_v15 = vld.sshfl [vmem:[#allocation1 + $0x20] sm:$0xff pattern:$0x73625140] }
 0x133   :  { %4037 = vst [vmem:[#allocation30_spill] sm:$0xff] %v3030_v8  ;;  %v3054_v8 = vld [vmem:[%s3497_s2 + $0x360] sm:$0xff] }
 0x134   :  { %4038 = vst [vmem:[#allocation31_spill] sm:$0xff] %v3036_v34  ;;  %899 = vmatpush.msrb.mxu2 %v3054_v8  ;;  %v3060_v34 = vld [vmem:[%s3497_s2 + $0x3e8] sm:$0xff] }
 0x135   :  { %4039 = vst [vmem:[#allocation32_spill] sm:$0xff] %v3042_v0  ;;  %918 = vmatpush.msrb.mxu3 %v3060_v34  ;;  %v3066_v0 = vld [vmem:[%s3497_s2 + $0x258] sm:$0xff] }
 0x136   :  { %4040 = vst [vmem:[#allocation33_spill] sm:$0xff] %v3048_v1  ;;  %860 = vmatpush.msrb.mxu0 %v3066_v0  ;;  %v3072_v1 = vld [vmem:[%s3497_s2 + $0x2e0] sm:$0xff] }
 0x137   :  { %4041 = vst [vmem:[#allocation34_spill] sm:$0xff] %v3054_v8  ;;  %879 = vmatpush.msrb.mxu1 %v3072_v1  ;;  %v3078_v8 = vld [vmem:[%s3497_s2 + $0x358] sm:$0xff] }
 0x138   :  { %4042 = vst [vmem:[#allocation35_spill] sm:$0xff] %v3060_v34  ;;  %900 = vmatpush.msrb.mxu2 %v3078_v8  ;;  %v3084_v34 = vld [vmem:[%s3497_s2 + $0x3e0] sm:$0xff] }
 0x139   :  { %4043 = vst [vmem:[#allocation36_spill] sm:$0xff] %v3066_v0  ;;  %919 = vmatpush.msrb.mxu3 %v3084_v34  ;;  %v3090_v0 = vld [vmem:[%s3497_s2 + $0x250] sm:$0xff] }
 0x13a   :  { %4044 = vst [vmem:[#allocation60_spill] sm:$0xff] %v3072_v1  ;;  %861 = vmatpush.msrb.mxu0 %v3090_v0  ;;  %v3096_v1 = vld [vmem:[%s3497_s2 + $0x2d8] sm:$0xff] }
 0x13b   :  { %4045 = vst [vmem:[#allocation37_spill] sm:$0xff] %v3078_v8  ;;  %880 = vmatpush.msrb.mxu1 %v3096_v1  ;;  %v3102_v8 = vld [vmem:[%s3497_s2 + $0x350] sm:$0xff] }
 0x13c   :  { %4046 = vst [vmem:[#allocation38_spill] sm:$0xff] %v3084_v34  ;;  %901 = vmatpush.msrb.mxu2 %v3102_v8  ;;  %v3108_v34 = vld [vmem:[%s3497_s2 + $0x3d8] sm:$0xff] }
 0x13d   :  { %4047 = vst [vmem:[#allocation39_spill] sm:$0xff] %v3090_v0  ;;  %920 = vmatpush.msrb.mxu3 %v3108_v34  ;;  %v3114_v0 = vld [vmem:[%s3497_s2 + $0x248] sm:$0xff] }
 0x13e   :  { %4048 = vst [vmem:[#allocation40_spill] sm:$0xff] %v3096_v1  ;;  %862 = vmatpush.msrb.mxu0 %v3114_v0  ;;  %v3117_v1 = vld.sshfl [vmem:[#allocation1 + $0x30] sm:$0xff pattern:$0x73625140] }
 0x13f   :  { %4049 = vst [vmem:[#allocation41_spill] sm:$0xff] %v3102_v8  ;;  %v3124_v8 = vld [vmem:[%s3497_s2 + $0x2d0] sm:$0xff]  ;;  %921 = vmatpush.msrb.mxu3 %v3140_v7  ;;  %v3160_v7 = vld [vmem:[%s3497_s2 + $0x340] sm:$0xff] }
 0x140   :  { %4050 = vst [vmem:[#allocation42_spill] sm:$0xff] %v3108_v34  ;;  %881 = vmatpush.msrb.mxu1 %v3124_v8  ;;  %v3130_v34 = vld [vmem:[%s3497_s2 + $0x348] sm:$0xff] }
 0x141   :  { %4051 = vst [vmem:[#allocation43_spill] sm:$0xff] %v3114_v0  ;;  %902 = vmatpush.msrb.mxu2 %v3130_v34  ;;  %v3135_v0 = vld.sshfl [vmem:[#allocation1 + $0x28] sm:$0xff pattern:$0x73625140] }
 0x142   :  { %4052 = vst [vmem:[#allocation44_spill] sm:$0xff] %v3124_v8  ;;  %v3146_v8 = vld [vmem:[%s3497_s2 + $0x240] sm:$0xff]  ;;  %882 = vmatpush.msrb.mxu1 %v3154_v24  ;;  %v4116_v12 = vld [vmem:[#allocation36_spill] sm:$0xff]  ;;  %v4118_v3 = vld [vmem:[#allocation37_spill] sm:$0xff] }
 0x143   :  { %4053 = vst [vmem:[#allocation46_spill] sm:$0xff] %v3130_v34  ;;  %863 = vmatpush.msrb.mxu0 %v3146_v8  ;;  %v4056_v34 = vsub.f32 1.0, %v3944_v33  ;;  %903 = vmatpush.msrb.mxu2 %v3160_v7  ;;  %v3172_v33 = vld [vmem:[%s3497_s2 + $0x238] sm:$0xff]  ;;  %v4117_v29 = vld [vmem:[#allocation60_spill] sm:$0xff] }
 0x144   :  { %4055 = vst [vmem:[#allocation49_spill] sm:$0xff] %v3146_v8  ;;  %v3166_v8 = vld [vmem:[%s3497_s2 + $0x3c8] sm:$0xff] }
 0x145   :  { %940 = vst [vmem:[#allocation1 + $0x20] ss:$4 sm:$0xff] %v4056_v34  ;;  %922 = vmatpush.msrb.mxu3 %v3166_v8  ;;  %864 = vmatpush.msrb.mxu0 %v3172_v33  ;;  %v3178_v34 = vld [vmem:[%s3497_s2 + $0x2c0] sm:$0xff] }
 0x146   :  { %4057 = vst [vmem:[#allocation50_spill] sm:$0xff] %v3160_v7  ;;  %883 = vmatpush.msrb.mxu1 %v3178_v34  ;;  %v3184_v7 = vld [vmem:[%s3497_s2 + $0x338] sm:$0xff] }
 0x147   :  { %4058 = vst [vmem:[#allocation51_spill] sm:$0xff] %v3166_v8  ;;  %904 = vmatpush.msrb.mxu2 %v3184_v7  ;;  %v3190_v8 = vld [vmem:[%s3497_s2 + $0x3c0] sm:$0xff] }
 0x148   :  { %4059 = vst [vmem:[#allocation52_spill] sm:$0xff] %v3172_v33  ;;  %923 = vmatpush.msrb.mxu3 %v3190_v8  ;;  %v3196_v33 = vld [vmem:[%s3497_s2 + $0x230] sm:$0xff] }
 0x149   :  { %4060 = vst [vmem:[#allocation53_spill] sm:$0xff] %v3178_v34  ;;  %865 = vmatpush.msrb.mxu0 %v3196_v33  ;;  %v3202_v34 = vld [vmem:[%s3497_s2 + $0x2b8] sm:$0xff] }
 0x14a   :  { %4061 = vst [vmem:[#allocation54_spill] sm:$0xff] %v3184_v7  ;;  %884 = vmatpush.msrb.mxu1 %v3202_v34  ;;  %v3208_v7 = vld [vmem:[%s3497_s2 + $0x330] sm:$0xff] }
 0x14b   :  { %4062 = vst [vmem:[#allocation55_spill] sm:$0xff] %v3190_v8  ;;  %905 = vmatpush.msrb.mxu2 %v3208_v7  ;;  %v3214_v8 = vld [vmem:[%s3497_s2 + $0x3b8] sm:$0xff] }
 0x14c   :  { %4063 = vst [vmem:[#allocation56_spill] sm:$0xff] %v3196_v33  ;;  %924 = vmatpush.msrb.mxu3 %v3214_v8  ;;  %v3220_v33 = vld [vmem:[%s3497_s2 + $0x228] sm:$0xff] }
 0x14d   :  { %4064 = vst [vmem:[#allocation57_spill] sm:$0xff] %v3202_v34  ;;  %866 = vmatpush.msrb.mxu0 %v3220_v33  ;;  %v3226_v34 = vld [vmem:[%s3497_s2 + $0x2b0] sm:$0xff] }
 0x14e   :  { %4065 = vst [vmem:[#allocation58_spill] sm:$0xff] %v3208_v7  ;;  %885 = vmatpush.msrb.mxu1 %v3226_v34  ;;  %v3232_v7 = vld [vmem:[%s3497_s2 + $0x328] sm:$0xff] }
 0x14f   :  { %4066 = vst [vmem:[#allocation59_spill] sm:$0xff] %v3214_v8  ;;  %906 = vmatpush.msrb.mxu2 %v3232_v7  ;;  %v3238_v8 = vld [vmem:[%s3497_s2 + $0x3b0] sm:$0xff] }
 0x150   :  { %4067 = vst [vmem:[#allocation61_spill] sm:$0xff] %v3220_v33  ;;  %925 = vmatpush.msrb.mxu3 %v3238_v8  ;;  %v3244_v33 = vld [vmem:[%s3497_s2 + $0x220] sm:$0xff] }
 0x151   :  { %4068 = vst [vmem:[#allocation63_spill] sm:$0xff] %v3226_v34  ;;  %867 = vmatpush.msrb.mxu0 %v3244_v33  ;;  %v3250_v34 = vld [vmem:[%s3497_s2 + $0x2a8] sm:$0xff]  ;;  %907 = vmatpush.msrb.mxu2 %v3988_v2 }
 0x152   :  { %886 = vmatpush.msrb.mxu1 %v3250_v34  ;;  %926 = vmatpush.msrb.mxu3 %v3989_v4  ;;  %v4082_v2 = vld [vmem:[#allocation48_spill] sm:$0xff]  ;;  %v4083_v4 = vld [vmem:[#allocation7_spill] sm:$0xff] }
 0x153   :  { %868 = vmatpush.msrb.mxu0 %v3990_v55  ;;  %908 = vmatpush.msrb.mxu2 %v3991_v48  ;;  %v4084_v55 = vld [vmem:[#allocation5_spill] sm:$0xff]  ;;  %v4085_v48 = vld [vmem:[#allocation8_spill] sm:$0xff] }
 0x154   :  { %887 = vmatpush.msrb.mxu1 %v3907_v41  ;;  %927 = vmatpush.msrb.mxu3 %v3992_v63  ;;  %v4071_v41 = vld [vmem:[#allocation76_spill] sm:$0xff]  ;;  %v4086_v63 = vld [vmem:[#allocation6_spill] sm:$0xff] }
 0x155   :  { %869 = vmatpush.msrb.mxu0 %v3993_v38  ;;  %909 = vmatpush.msrb.mxu2 %v2181_v59  ;;  %v4076_v59 = vld [vmem:[#allocation88_spill] sm:$0xff]  ;;  %v4087_v38 = vld [vmem:[#allocation11_spill] sm:$0xff] }
 0x156   :  { %888 = vmatpush.msrb.mxu1 %v3994_v19  ;;  %928 = vmatpush.msrb.mxu3 %v2186_v56  ;;  %v4080_v56 = vld [vmem:[#allocation96_spill] sm:$0xff]  ;;  %v4088_v19 = vld [vmem:[#allocation9_spill] sm:$0xff] }
 0x157   :  { %870 = vmatpush.msrb.mxu0 %v2193_v50  ;;  %910 = vmatpush.msrb.mxu2 %v3911_v40  ;;  %v4070_v40 = vld [vmem:[#allocation75_spill] sm:$0xff] }
 0x158   :  { %889 = vmatpush.msrb.mxu1 %v3910_v39  ;;  %929 = vmatpush.msrb.mxu3 %v3912_v54  ;;  %v4069_v39 = vld [vmem:[#allocation74_spill] sm:$0xff]  ;;  %v4075_v54 = vld [vmem:[#allocation87_spill] sm:$0xff] }
 0x159   :  { %871 = vmatpush.msrb.mxu0 %v3913_v43  ;;  %911 = vmatpush.msrb.mxu2 %v3915_v60  ;;  %v4072_v43 = vld [vmem:[#allocation77_spill] sm:$0xff]  ;;  %v4079_v50 = vld [vmem:[#allocation91_spill] sm:$0xff] }
 0x15a   :  { %890 = vmatpush.msrb.mxu1 %v3914_v53  ;;  %930 = vmatpush.msrb.mxu3 %v3916_v58  ;;  %v4074_v53 = vld [vmem:[#allocation82_spill] sm:$0xff]  ;;  %v4077_v60 = vld [vmem:[#allocation89_spill] sm:$0xff] }
 0x15b   :  { %957 = vmatpush.msra.mxu0 %v2583_v11  ;;  %997 = vmatpush.msra.mxu2 %v2589_v14  ;;  %v4081_v58 = vld [vmem:[#allocation97_spill] sm:$0xff]  ;;  %v4089_v11 = vld [vmem:[#allocation12_spill] sm:$0xff]  ;;  %v4090_v14 = vld [vmem:[#allocation10_spill] sm:$0xff] }
 0x15c   :  { %891 = vmatpush.msrb.mxu1 %v2252_v45  ;;  %931 = vmatpush.msrb.mxu3 %v2259_v52  ;;  %v4073_v45 = vld [vmem:[#allocation78_spill] sm:$0xff] }
 0x15d   :  { %958 = vmatpush.msra.mxu0 %v2599_v16  ;;  %998 = vmatpush.msra.mxu2 %v2611_v9  ;;  %v4078_v52 = vld [vmem:[#allocation90_spill] sm:$0xff]  ;;  %v3334_v16 = vpop.f32.mrf.mxu0  ;;  %v4092_v9 = vld [vmem:[#allocation15_spill] sm:$0xff] }
 0x15e   :  { %977 = vmatpush.msra.mxu1 %v2605_v17  ;;  %1017 = vmatpush.msra.mxu3 %v2617_v18  ;;  %v4091_v17 = vld [vmem:[#allocation45_spill] sm:$0xff] }
 0x15f   :  { %959 = vmatpush.msra.mxu0 %v2624_v22  ;;  %999 = vmatpush.msra.mxu2 %v2636_v26  ;;  %v4093_v18 = vld [vmem:[#allocation13_spill] sm:$0xff]  ;;  %v4094_v22 = vld [vmem:[#allocation16_spill] sm:$0xff]  ;;  %v4095_v26 = vld [vmem:[#allocation14_spill] sm:$0xff] }
 0x160   :  { %978 = vmatpush.msra.mxu1 %v2630_v25  ;;  %1018 = vmatpush.msra.mxu3 %v2642_v13  ;;  %v3340_v25 = vpop.f32.mrf.mxu1  ;;  %v4096_v13 = vld [vmem:[#allocation19_spill] sm:$0xff] }
 0x161   :  { %912 = vmatmul.f32.vlgmr.msrb.gmra.mxu2 %v3117_v1  ;;  %960 = vmatpush.msra.mxu0 %v2648_v27  ;;  %v3344_v27 = vpop.f32.mrf.mxu2  ;;  %v4120_v1 = vld [vmem:[#allocation39_spill] sm:$0xff] }
 0x162   :  { %979 = vmatpush.msra.mxu1 %v2654_v28  ;;  %1000 = vmatpush.msra.mxu2 %v2660_v30  ;;  %v4097_v28 = vld [vmem:[#allocation17_spill] sm:$0xff]  ;;  %v4098_v30 = vld [vmem:[#allocation20_spill] sm:$0xff] }
 0x163   :  { %1019 = vmatpush.msra.mxu3 %v2666_v31  ;;  %872 = vmatmul.f32.vlgmr.msrb.gmra.mxu0 %v3119_v15  ;;  %v4099_v31 = vld [vmem:[#allocation18_spill] sm:$0xff]  ;;  %v4115_v15 = vld [vmem:[#allocation35_spill] sm:$0xff] }
 0x164   :  { %932 = vmatmul.f32.vlgmr.msrb.gmra.mxu3 %v3133_v10  ;;  %961 = vmatpush.msra.mxu0 %v2672_v32  ;;  %v4100_v32 = vld [vmem:[#allocation23_spill] sm:$0xff] }
 0x165   :  { %980 = vmatpush.msra.mxu1 %v2678_v35  ;;  %1001 = vmatpush.msra.mxu2 %v2684_v36  ;;  %v4101_v35 = vld [vmem:[#allocation21_spill] sm:$0xff]  ;;  %v4102_v36 = vld [vmem:[#allocation24_spill] sm:$0xff] }
 0x166   :  { %1020 = vmatpush.msra.mxu3 %v2690_v37  ;;  %892 = vmatmul.f32.vlgmr.msrb.gmra.mxu1 %v3135_v0  ;;  %v3352_v37 = vpop.f32.mrf.mxu3  ;;  %v4119_v0 = vld [vmem:[#allocation38_spill] sm:$0xff] }
 0x167   :  { %962 = vmatpush.msra.mxu0 %v2696_v44  ;;  %981 = vmatpush.msra.mxu1 %v2702_v47  ;;  %v4103_v44 = vld [vmem:[#allocation22_spill] sm:$0xff]  ;;  %v4104_v47 = vld [vmem:[#allocation27_spill] sm:$0xff] }
 0x168   :  { %1002 = vmatpush.msra.mxu2 %v2708_v57  ;;  %1021 = vmatpush.msra.mxu3 %v2714_v49  ;;  %v4105_v57 = vld [vmem:[#allocation25_spill] sm:$0xff]  ;;  %v4106_v49 = vld [vmem:[#allocation28_spill] sm:$0xff]  ;;  %v3368_v10 = vpop.f32.mrf.mxu1 }
 0x169   :  { %963 = vmatpush.msra.mxu0 %v2720_v51  ;;  %982 = vmatpush.msra.mxu1 %v2726_v61  ;;  %v4107_v51 = vld [vmem:[#allocation26_spill] sm:$0xff]  ;;  %v3372_v21 = vpop.f32.mrf.mxu2 }
 0x16a   :  { %1003 = vmatpush.msra.mxu2 %v2732_v46  ;;  %1022 = vmatpush.msra.mxu3 %v2738_v62  ;;  %v4108_v61 = vld [vmem:[#allocation62_spill] sm:$0xff]  ;;  %v4109_v46 = vld [vmem:[#allocation29_spill] sm:$0xff] }
 0x16b   :  { %964 = vmatpush.msra.mxu0 %v2744_v42  ;;  %983 = vmatpush.msra.mxu1 %v2750_v5  ;;  %v4110_v62 = vld [vmem:[#allocation30_spill] sm:$0xff]  ;;  %v3362_v42 = vpop.f32.mrf.mxu0  ;;  %v4111_v5 = vld [vmem:[#allocation31_spill] sm:$0xff] }
 0x16c   :  { %1004 = vmatpush.msra.mxu2 %v2756_v20  ;;  %1023 = vmatpush.msra.mxu3 %v2762_v23  ;;  %v4112_v20 = vld [vmem:[#allocation32_spill] sm:$0xff]  ;;  %v4113_v23 = vld [vmem:[#allocation33_spill] sm:$0xff] }
 0x16d   :  { %965 = vmatpush.msra.mxu0 %v2768_v6  ;;  %984 = vmatpush.msra.mxu1 %v4069_v39  ;;  %v4114_v6 = vld [vmem:[#allocation34_spill] sm:$0xff]  ;;  %v4121_v39 = vld [vmem:[#allocation40_spill] sm:$0xff] }
 0x16e   :  { %1005 = vmatpush.msra.mxu2 %v4070_v40  ;;  %1024 = vmatpush.msra.mxu3 %v4071_v41  ;;  %v4122_v40 = vld [vmem:[#allocation41_spill] sm:$0xff]  ;;  %v3380_v41 = vpop.f32.mrf.mxu3 }
 0x16f   :  { %966 = vmatpush.msra.mxu0 %v4072_v43  ;;  %985 = vmatpush.msra.mxu1 %v4073_v45  ;;  %v4123_v43 = vld [vmem:[#allocation42_spill] sm:$0xff]  ;;  %v4124_v45 = vld [vmem:[#allocation43_spill] sm:$0xff] }
 0x170   :  { %1006 = vmatpush.msra.mxu2 %v4074_v53  ;;  %1025 = vmatpush.msra.mxu3 %v4075_v54  ;;  %v4125_v53 = vld [vmem:[#allocation44_spill] sm:$0xff]  ;;  %v4126_v54 = vld [vmem:[#allocation46_spill] sm:$0xff] }
 0x171   :  { %967 = vmatpush.msra.mxu0 %v4076_v59  ;;  %986 = vmatpush.msra.mxu1 %v4077_v60  ;;  %v4127_v59 = vld [vmem:[#allocation47_spill] sm:$0xff]  ;;  %v4128_v60 = vld [vmem:[#allocation49_spill] sm:$0xff] }
 0x172   :  { %1007 = vmatpush.msra.mxu2 %v4078_v52  ;;  %1026 = vmatpush.msra.mxu3 %v4079_v50  ;;  %v4129_v50 = vld [vmem:[#allocation50_spill] sm:$0xff] }
 0x173   :  { %968 = vmatpush.msra.mxu0 %v4080_v56  ;;  %987 = vmatpush.msra.mxu1 %v4081_v58  ;;  %v610_v52 = vpop.f32.mrf.mxu0  ;;  %v4130_v56 = vld [vmem:[#allocation51_spill] sm:$0xff]  ;;  %v4131_v58 = vld [vmem:[#allocation52_spill] sm:$0xff] }
 0x174   :  { %1008 = vmatpush.msra.mxu2 %v4082_v2  ;;  %1027 = vmatpush.msra.mxu3 %v4083_v4  ;;  %v630_v2 = vpop.f32.mrf.mxu1  ;;  %v4132_v4 = vld [vmem:[#allocation53_spill] sm:$0xff] }
 0x175   :  { %969 = vmatpush.msra.mxu0 %v4084_v55  ;;  %988 = vmatpush.msra.mxu1 %v4085_v48  ;;  %v4133_v55 = vld [vmem:[#allocation54_spill] sm:$0xff]  ;;  %v631_v48 = vadd.f32 %v630_v2, %v610_v52 }
 0x176   :  { %1009 = vmatpush.msra.mxu2 %v4086_v63  ;;  %1028 = vmatpush.msra.mxu3 %v4087_v38  ;;  %v650_v63 = vpop.f32.mrf.mxu2  ;;  %v4134_v38 = vld [vmem:[#allocation55_spill] sm:$0xff] }
 0x177   :  { %970 = vmatpush.msra.mxu0 %v4088_v19  ;;  %989 = vmatpush.msra.mxu1 %v4089_v11  ;;  %v4135_v19 = vld [vmem:[#allocation56_spill] sm:$0xff]  ;;  %v4136_v11 = vld [vmem:[#allocation57_spill] sm:$0xff] }
 0x178   :  { %1010 = vmatpush.msra.mxu2 %v4090_v14  ;;  %1029 = vmatpush.msra.mxu3 %v4091_v17  ;;  %v943_v14 = vld.sshfl [vmem:[#allocation1 + $0x10] sm:$0xff pattern:$0x73625140]  ;;  %v651_v17 = vadd.f32 %v650_v63, %v631_v48 }
 0x179   :  { %971 = vmatpush.msra.mxu0 %v4092_v9  ;;  %990 = vmatpush.msra.mxu1 %v4093_v18  ;;  %v4138_v9 = vld [vmem:[#allocation59_spill] sm:$0xff]  ;;  %v4139_v18 = vld [vmem:[#allocation61_spill] sm:$0xff] }
 0x17a   :  { %1011 = vmatpush.msra.mxu2 %v4094_v22  ;;  %1030 = vmatpush.msra.mxu3 %v4095_v26  ;;  %v670_v22 = vpop.f32.mrf.mxu3  ;;  %v4140_v26 = vld [vmem:[#allocation63_spill] sm:$0xff] }
 0x17b   :  { %972 = vmatpush.msra.mxu0 %v4096_v13  ;;  %991 = vmatpush.msra.mxu1 %v4097_v28  ;;  %v671_v13 = vadd.f32 %v670_v22, %v651_v17  ;;  %v450_v28 = vadd.f32 %v3340_v25, %v3334_v16 }
 0x17c   :  { %1012 = vmatpush.msra.mxu2 %v4098_v30  ;;  %1031 = vmatpush.msra.mxu3 %v4099_v31  ;;  %v941_v30 = vld.sshfl [vmem:[#allocation1] sm:$0xff pattern:$0x73625140]  ;;  %v944_v31 = vld.sshfl [vmem:[#allocation1 + $0x18] sm:$0xff pattern:$0x73625140]  ;;  %v690_v16 = vpop.f32.mrf.mxu0 }
 0x17d   :  { %1037 = vmatpush.msrb.mxu0 %v4100_v32  ;;  %992 = vmatpush.msra.mxu1 %v4102_v36  ;;  %v1389_v32 = vld [vmem:[%s3497_s2 + $0x320] sm:$0xff]  ;;  %v691_v25 = vadd.f32 %v690_v16, %v671_v13  ;;  %v1393_v36 = vld [vmem:[%s3497_s2 + $0x318] sm:$0xff] }
 0x17e   :  { %1077 = vmatpush.msrb.mxu2 %v4101_v35  ;;  %1032 = vmatpush.msra.mxu3 %v4103_v44  ;;  %v470_v35 = vadd.f32 %v3344_v27, %v450_v28  ;;  %v1394_v44 = vld [vmem:[%s3497_s2 + $0x3a0] sm:$0xff]  ;;  %v1395_v27 = vld [vmem:[%s3497_s2 + $0x210] sm:$0xff] }
 0x17f   :  { %1038 = vmatpush.msrb.mxu0 %v4104_v47  ;;  %1057 = vmatpush.msrb.mxu1 %v4105_v57  ;;  %v1396_v57 = vld [vmem:[%s3497_s2 + $0x298] sm:$0xff] }
 0x180   :  { %1078 = vmatpush.msrb.mxu2 %v4106_v49  ;;  %1097 = vmatpush.msrb.mxu3 %v4107_v51  ;;  %v710_v47 = vpop.f32.mrf.mxu1  ;;  %v1397_v49 = vld [vmem:[%s3497_s2 + $0x310] sm:$0xff] }
 0x181   :  { %1039 = vmatpush.msrb.mxu0 %v4108_v61  ;;  %1058 = vmatpush.msrb.mxu1 %v4109_v46  ;;  %v711_v51 = vadd.f32 %v710_v47, %v691_v25  ;;  %v730_v61 = vpop.f32.mrf.mxu2  ;;  %v490_v46 = vadd.f32 %v3352_v37, %v470_v35  ;;  %v1401_v37 = vld [vmem:[%s3497_s2 + $0x308] sm:$0xff] }
 0x182   :  { %1079 = vmatpush.msrb.mxu2 %v4110_v62  ;;  %1098 = vmatpush.msrb.mxu3 %v4111_v5  ;;  %v1398_v62 = vld [vmem:[%s3497_s2 + $0x398] sm:$0xff]  ;;  %v1399_v5 = vld [vmem:[%s3497_s2 + $0x208] sm:$0xff] }
 0x183   :  { %1040 = vmatpush.msrb.mxu0 %v4112_v20  ;;  %1059 = vmatpush.msrb.mxu1 %v4113_v23  ;;  %v1155_v20 = vpop.permute.xlu0 %1154  ;;  %v1400_v23 = vld [vmem:[%s3497_s2 + $0x290] sm:$0xff] }
 0x184   :  { %1080 = vmatpush.msrb.mxu2 %v4114_v6  ;;  %1099 = vmatpush.msrb.mxu3 %v4115_v15  ;;  %v945_v6 = vld.sshfl [vmem:[#allocation1 + $0x20] sm:$0xff pattern:$0x73625140]  ;;  %1269 = vrcp.f32 %v1155_v20  ;;  %v731_v15 = vadd.f32 %v730_v61, %v711_v51  ;;  %v1168_v2 = vand.u32 2147483648, %v1155_v20  ;;  %v1166_v48 = vand.u32 2147483647, %v1155_v20 }
 0x185   :  { %1041 = vmatpush.msrb.mxu0 %v4116_v12  ;;  %1060 = vmatpush.msrb.mxu1 %v4117_v29  ;;  %v1402_v12 = vld [vmem:[%s3497_s2 + $0x390] sm:$0xff]  ;;  %v1403_v29 = vld [vmem:[%s3497_s2 + $0x200] sm:$0xff]  ;;  %vm1162_vm5 = vweird.f32 %v1155_v20 }
 0x186   :  { %1081 = vmatpush.msrb.mxu2 %v4118_v3  ;;  %1100 = vmatpush.msrb.mxu3 %v4119_v0  ;;  %v947_v3 = vld.sshfl [vmem:[#allocation1 + $0x30] sm:$0xff pattern:$0x73625140]  ;;  %v750_v0 = vpop.f32.mrf.mxu3  ;;  %vm1167_vm7 = vcmp.eq.f32.partialorder %v1166_v48, 8.507059e+37 }
 0x187   :  { %1042 = vmatpush.msrb.mxu0 %v4120_v1  ;;  %1061 = vmatpush.msrb.mxu1 %v4121_v39  ;;  %v1404_v1 = vld [vmem:[%s3497_s2 + $0x288] sm:$0xff]  ;;  %v1405_v39 = vld [vmem:[%s3497_s2 + $0x300] sm:$0xff]  ;;  %v4142_v61 = vld [vmem:[#allocation93_spill] sm:$0xff] }
 0x188   :  { %1082 = vmatpush.msrb.mxu2 %v4122_v40  ;;  %1101 = vmatpush.msrb.mxu3 %v4123_v43  ;;  %v946_v40 = vld.sshfl [vmem:[#allocation1 + $0x28] sm:$0xff pattern:$0x73625140]  ;;  %v751_v43 = vadd.f32 %v750_v0, %v731_v15 }
 0x189   :  { %1043 = vmatpush.msrb.mxu0 %v4124_v45  ;;  %1062 = vmatpush.msrb.mxu1 %v4125_v53  ;;  %v510_v45 = vadd.f32 %v3362_v42, %v490_v46  ;;  %v1406_v53 = vld [vmem:[%s3497_s2 + $0x388] sm:$0xff]  ;;  %v182_v46 = vsel %vm180_vm12, %v4142_v61, 0.0 }
 0x18a   :  { %1083 = vmatpush.msrb.mxu2 %v4126_v54  ;;  %1102 = vmatpush.msrb.mxu3 %v4127_v59  ;;  %v948_v54 = vld.sshfl [vmem:[#allocation1 + $0x38] sm:$0xff pattern:$0x73625140]  ;;  %v1407_v59 = vld [vmem:[%s3497_s2 + $0x280] sm:$0xff]  ;;  %vm1117_vm3 = vcmp.gt.f32.partialorder %v751_v43, 0.0  ;;  %v1270_v52 = vpop.eup %1269 }
 0x18b   :  { %1044 = vmatpush.msrb.mxu0 %v4128_v60  ;;  %1063 = vmatpush.msrb.mxu1 %v3154_v24  ;;  %v4137_v24 = vld [vmem:[#allocation58_spill] sm:$0xff]  ;;  %v1408_v60 = vld [vmem:[%s3497_s2 + $0x380] sm:$0xff]  ;;  %v1118_v42 = vsel %vm1117_vm3, %v751_v43, 1.0  ;;  %vm1163_vm4 = vweird.f32 %v1270_v52 }
 0x18c   :  { %1084 = vmatpush.msrb.mxu2 %v4129_v50  ;;  %1103 = vmatpush.msrb.mxu3 %v4130_v56  ;;  %1271 = vrcp.f32 %v1118_v42  ;;  %v530_v50 = vadd.f32 %v3368_v10, %v510_v45  ;;  %v1158_v56 = vmul.f32 %v1270_v52, %v1155_v20  ;;  %vm1164_vm6 = vmor %vm1162_vm5, %vm1163_vm4  ;;  %v1130_v10 = vand.u32 2147483648, %v1118_v42  ;;  %v4143_v20 = vld [vmem:[#allocation94_spill] sm:$0xff] }
 0x18d   :  { %1045 = vmatpush.msrb.mxu0 %v4131_v58  ;;  %1064 = vmatpush.msrb.mxu1 %v4132_v4  ;;  %v1128_v22 = vand.u32 2147483647, %v1118_v42  ;;  %vm1124_vm9 = vweird.f32 %v1118_v42 }
 0x18e   :  { %1085 = vmatpush.msrb.mxu2 %v4133_v55  ;;  %1104 = vmatpush.msrb.mxu3 %v4134_v38  ;;  %v1159_v58 = vsub.f32 1.0, %v1158_v56  ;;  %v550_v4 = vadd.f32 %v3372_v21, %v530_v50  ;;  %v1131_v13 = vor.u32 1.1754944e-38, %v1130_v10  ;;  %v4148_v50 = vld [vmem:[#allocation101_spill] sm:$0xff] }
 0x18f   :  { %1046 = vmatpush.msrb.mxu0 %v4135_v19  ;;  %1065 = vmatpush.msrb.mxu1 %v4136_v11  ;;  %v1169_v11 = vor.u32 1.1754944e-38, %v1168_v2  ;;  %vm1129_vm11 = vcmp.eq.f32.partialorder %v1128_v22, 8.507059e+37  ;;  %v194_v56 = vsel %vm180_vm12, %v4148_v50, 0.0 }
 0x190   :  { %1086 = vmatpush.msrb.mxu2 %v4137_v24  ;;  %1105 = vmatpush.msrb.mxu3 %v4138_v9  ;;  %v1160_v55 = vmul.f32 %v1270_v52, %v1159_v58  ;;  %v570_v24 = vadd.f32 %v3380_v41, %v550_v4 }
 0x191   :  { %1047 = vmatpush.msrb.mxu0 %v4139_v18  ;;  %1066 = vmatpush.msrb.mxu1 %v4140_v26 }
 0x192   :  { %1087 = vmatpush.msrb.mxu2 %v3232_v7  ;;  %1106 = vmatpush.msrb.mxu3 %v3238_v8  ;;  %v1390_v7 = vld [vmem:[%s3497_s2 + $0x3a8] sm:$0xff]  ;;  %v1272_v63 = vpop.eup %1271  ;;  %v1161_v19 = vadd.f32 %v1270_v52, %v1160_v55 }
 0x193   :  { %1013 = vmatmul.f32.vlgmr.msra.gmra.mxu2 %v943_v14  ;;  %1048 = vmatpush.msrb.mxu0 %v3244_v33  ;;  %v942_v8 = vld.sshfl [vmem:[#allocation1 + $0x8] sm:$0xff pattern:$0x73625140]  ;;  %v1391_v33 = vld [vmem:[%s3497_s2 + $0x218] sm:$0xff]  ;;  %v1120_v38 = vmul.f32 %v1272_v63, %v1118_v42  ;;  %vm1125_vm8 = vweird.f32 %v1272_v63 }
 0x194   :  { %1067 = vmatpush.msrb.mxu1 %v3250_v34  ;;  %1088 = vmatpush.msrb.mxu2 %v1389_v32  ;;  %v1392_v34 = vld [vmem:[%s3497_s2 + $0x2a0] sm:$0xff]  ;;  %v1165_v17 = vsel %vm1164_vm6, %v1270_v52, %v1161_v19  ;;  %vm1126_vm10 = vmor %vm1124_vm9, %vm1125_vm8  ;;  %s1436_s2 = smov 96  }
 0x195   :  { %1107 = vmatpush.msrb.mxu3 %v1390_v7  ;;  %973 = vmatmul.f32.vlgmr.msra.gmra.mxu0 %v941_v30  ;;  %v1121_v14 = vsub.f32 1.0, %v1120_v38  ;;  %v1170_v9 = vsel %vm1167_vm7, %v1169_v11, %v1165_v17 }
 0x196   :  { %1033 = vmatmul.f32.vlgmr.msra.gmra.mxu3 %v944_v31  ;;  %1049 = vmatpush.msrb.mxu0 %v1391_v33  ;;  %v1171_v21 = vmul.f32 %v1170_v9, %v570_v24 }
 0x197   :  { %1068 = vmatpush.msrb.mxu1 %v1392_v34  ;;  %1089 = vmatpush.msrb.mxu2 %v1393_v36  ;;  %v1122_v18 = vmul.f32 %v1272_v63, %v1121_v14 }
 0x198   :  { %1108 = vmatpush.msrb.mxu3 %v1394_v44  ;;  %993 = vmatmul.f32.vlgmr.msra.gmra.mxu1 %v942_v8  ;;  %1273 = vlog2.f32 %v1171_v21 }
 0x199   :  { %1050 = vmatpush.msrb.mxu0 %v1395_v27  ;;  %1069 = vmatpush.msrb.mxu1 %v1396_v57  ;;  %v1123_v26 = vadd.f32 %v1272_v63, %v1122_v18 }
 0x19a   :  { %1090 = vmatpush.msrb.mxu2 %v1397_v49  ;;  %1109 = vmatpush.msrb.mxu3 %v1398_v62  ;;  %v4141_v49 = vld [vmem:[#allocation92_spill] sm:$0xff] }
 0x19b   :  { %1051 = vmatpush.msrb.mxu0 %v1399_v5  ;;  %1070 = vmatpush.msrb.mxu1 %v1400_v23  ;;  %v1127_v28 = vsel %vm1126_vm10, %v1272_v63, %v1123_v26  ;;  %v181_v51 = vsel %vm180_vm12, %v4141_v49, 0.0  ;;  %v184_v23 = vsel %vm180_vm12, %v4143_v20, 0.0 }
 0x19c   :  { %1091 = vmatpush.msrb.mxu2 %v1401_v37  ;;  %1110 = vmatpush.msrb.mxu3 %v1402_v12  ;;  %v1132_v30 = vsel %vm1129_vm11, %v1131_v13, %v1127_v28  ;;  %v183_v62 = vadd.f32 %v182_v46, %v181_v51  ;;  %v4145_v12 = vld [vmem:[#allocation98_spill] sm:$0xff] }
 0x19d   :  { %1052 = vmatpush.msrb.mxu0 %v1403_v29  ;;  %1071 = vmatpush.msrb.mxu1 %v1404_v1  ;;  %v1133_v31 = vmul.f32 %v1132_v30, %v570_v24  ;;  %v188_v29 = vsel %vm180_vm12, %v4145_v12, 0.0 }
 0x19e   :  { %1092 = vmatpush.msrb.mxu2 %v1405_v39  ;;  %1111 = vmatpush.msrb.mxu3 %v1406_v53  ;;  %v1274_v32 = vpop.eup %1273  ;;  %v185_v37 = vadd.f32 %v184_v23, %v183_v62 }
 0x19f   :  { %1053 = vmatmul.f32.vlgmr.msrb.gmra.mxu0 %v945_v6  ;;  %1093 = vmatmul.f32.vlgmr.msrb.gmra.mxu2 %v947_v3  ;;  %1275 = vlog2.f32 %v1133_v31  ;;  %v1206_v41 = vmul.f32 0.6931472, %v1274_v32  ;;  %v4144_v6 = vld [vmem:[#allocation95_spill] sm:$0xff] }
 0x1a0   :  { %1072 = vmatpush.msrb.mxu1 %v1407_v59  ;;  %1112 = vmatpush.msrb.mxu3 %v1408_v60  ;;  %v793_v35 = vpop.f32.mrf.mxu0  ;;  %v186_v15 = vsel %vm180_vm12, %v4144_v6, 0.0  ;;  %v4147_v59 = vld [vmem:[#allocation100_spill] sm:$0xff] }
 0x1a1   :  { %1073 = vmatmul.f32.vlgmr.msrb.gmra.mxu1 %v946_v40  ;;  %1113 = vmatmul.f32.vlgmr.msrb.gmra.mxu3 %v948_v54  ;;  %v1207_v7 = vmax.f32 %v1206_v41, -100.0  ;;  %v187_v1 = vadd.f32 %v186_v15, %v185_v37  ;;  %v4146_v40 = vld [vmem:[#allocation99_spill] sm:$0xff]  ;;  %v192_v60 = vsel %vm180_vm12, %v4147_v59, 0.0 }
 0x1a2   :  { %v190_v43 = vsel %vm180_vm12, %v4146_v40, 0.0 }
 0x1a3   :  { %1209 = vrot.lane.b32.xlu1 %v1207_v7, %s1436_s2  ;;  %v189_v45 = vadd.f32 %v188_v29, %v187_v1 }
 0x1a5   :  { %v1276_v16 = vpop.eup %1275  ;;  %v191_v42 = vadd.f32 %v190_v43, %v189_v45 }
 0x1a6   :  { %v1173_v8 = vmul.f32 0.6931472, %v1276_v16 }
 0x1a7   :  { %v193_v2 = vadd.f32 %v192_v60, %v191_v42 }
 0x1a8   :  { %v1174_v25 = vmax.f32 %v1173_v8, -100.0 }
 0x1a9   :  { %v195_v55 = vadd.f32 %v194_v56, %v193_v2  ;;  %v1223_v2 = vlaneseq }
 0x1aa   :  { %1176 = vrot.lane.b32.xlu0 %v1174_v25, %s1436_s2 }
 0x1ad   :  { %v813_v33 = vpop.f32.mrf.mxu1  ;;  %v853_v36 = vpop.f32.mrf.mxu3 }
 0x1ae   :  { %v833_v34 = vpop.f32.mrf.mxu2  ;;  %v814_v63 = vadd.f32 %v813_v33, %v793_v35 }
 0x1b0   :  { %v834_v24 = vadd.f32 %v833_v34, %v814_v63 }
 0x1b2   :  { %v854_v10 = vadd.f32 %v853_v36, %v834_v24 }
 0x1cd   :  { %196 = vadd.xlane.f32.xlu1 %v195_v55 }
 0x1e0   :  { %v873_v44 = vpop.f32.mrf.mxu0 }
 0x1e1   :  { %v874_v22 = vadd.f32 %v873_v44, %v854_v10 }
 0x1e3   :  { %v893_v27 = vpop.f32.mrf.mxu1 }
 0x1e4   :  { %v913_v47 = vpop.f32.mrf.mxu2  ;;  %v894_v13 = vadd.f32 %v893_v27, %v874_v22 }
 0x1e6   :  { %v914_v7 = vadd.f32 %v913_v47, %v894_v13 }
 0x1e7   :  { %v933_v57 = vpop.f32.mrf.mxu3 }
 0x1e8   :  { %v934_v33 = vadd.f32 %v933_v57, %v914_v7 }
 0x212   :  { %v974_v5 = vpop.f32.mrf.mxu0 }
 0x215   :  { %v994_v3 = vpop.f32.mrf.mxu1  ;;  %v1210_v18 = vpop.permute.xlu1 %1209 }
 0x216   :  { %v1014_v0 = vpop.f32.mrf.mxu2  ;;  %v995_v39 = vadd.f32 %v994_v3, %v974_v5  ;;  %v1212_v21 = vsel %vm1179_vm14, %v1210_v18, 0.0 }
 0x217   :  { %1213 = vadd.xlane.f32.xlu0 %v1212_v21 }
 0x218   :  { %v1015_v53 = vadd.f32 %v1014_v0, %v995_v39 }
 0x219   :  { %v1034_v54 = vpop.f32.mrf.mxu3 }
 0x21a   :  { %v1035_v52 = vadd.f32 %v1034_v54, %v1015_v53 }
 0x21c   :  { %v1054_v58 = vpop.f32.mrf.mxu0  ;;  %v1177_v30 = vpop.permute.xlu0 %1176 }
 0x21d   :  { %v1055_v4 = vadd.f32 %v1054_v58, %v1035_v52  ;;  %v1180_v32 = vsel %vm1179_vm14, %v1177_v30, 0.0 }
 0x21e   :  { %v1074_v48 = vpop.f32.mrf.mxu1  ;;  %1181 = vadd.xlane.f32.xlu2 %v1180_v32 }
 0x21f   :  { %v1075_v38 = vadd.f32 %v1074_v48, %v1055_v4  ;;  %v1224_v4 = vshrl.u32 %v1223_v2, 7 }
 0x221   :  { %vm1228_vm3 = vcmp.eq.s32.totalorder %v1224_v4, 3  ;;  %vm1227_vm4 = vcmp.eq.s32.totalorder %v1224_v4, 2  ;;  %vm1226_vm5 = vcmp.eq.s32.totalorder %v1224_v4, 1  ;;  %vm1225_vm6 = vcmp.eq.s32.totalorder %v1224_v4, 0 }
 0x222   :  { %v1094_v19 = vpop.f32.mrf.mxu2 }
 0x223   :  { %v1095_v11 = vadd.f32 %v1094_v19, %v1075_v38 }
 0x224   :  { %v1114_v14 = vpop.f32.mrf.mxu3 }
 0x225   :  { %v1115_v17 = vadd.f32 %v1114_v14, %v1095_v11 }
 0x227   :  { %vm1134_vm13 = vcmp.gt.f32.partialorder %v1115_v17, 0.0 }
 0x228   :  { %v1135_v9 = vsel %vm1134_vm13, %v1115_v17, 1.0 }
 0x229   :  { %1277 = vrcp.f32 %v1135_v9  ;;  %v1147_v41 = vand.u32 2147483648, %v1135_v9  ;;  %v1145_v8 = vand.u32 2147483647, %v1135_v9  ;;  %vm1141_vm0 = vweird.f32 %v1135_v9 }
 0x22b   :  { %v1148_v35 = vor.u32 1.1754944e-38, %v1147_v41  ;;  %vm1146_vm2 = vcmp.eq.f32.partialorder %v1145_v8, 8.507059e+37 }
 0x22f   :  { %v1278_v26 = vpop.eup %1277 }
 0x230   :  { %v1137_v28 = vmul.f32 %v1278_v26, %v1135_v9  ;;  %vm1142_vm15 = vweird.f32 %v1278_v26 }
 0x231   :  { %vm1143_vm1 = vmor %vm1141_vm0, %vm1142_vm15 }
 0x232   :  { %v1138_v31 = vsub.f32 1.0, %v1137_v28 }
 0x234   :  { %v1139_v16 = vmul.f32 %v1278_v26, %v1138_v31 }
 0x236   :  { %v1140_v25 = vadd.f32 %v1278_v26, %v1139_v16 }
 0x238   :  { %v1144_v34 = vsel %vm1143_vm1, %v1278_v26, %v1140_v25 }
 0x239   :  { %v1149_v36 = vsel %vm1146_vm2, %v1148_v35, %v1144_v34 }
 0x23a   :  { %v1150_v44 = vmul.f32 %v1149_v36, %v934_v33 }
 0x23c   :  { %1279 = vlog2.f32 %v1150_v44 }
 0x240   :  { %v197_v47 = vpop.xlane.xlu1 %196 }
 0x241   :  { %v198_v46 = vrot.slane %v197_v47, 4 }
 0x242   :  { %v1280_v27 = vpop.eup %1279 }
 0x243   :  { %v1192_v49 = vmul.f32 0.6931472, %v1280_v27  ;;  %v199_v62 = vadd.f32 %v198_v46, %v197_v47 }
 0x245   :  { %v1193_v51 = vmax.f32 %v1192_v49, -100.0  ;;  %v200_v5 = vrot.slane %v199_v62, 2 }
 0x247   :  { %v1194_v61 = vsel %vm1179_vm14, %v1193_v51, 0.0  ;;  %v201_v20 = vadd.f32 %v200_v5, %v199_v62 }
 0x248   :  { %1195 = vadd.xlane.f32.xlu2 %v1194_v61 }
 0x249   :  { %v202_v23 = vrot.slane %v201_v20, 1 }
 0x24b   :  { %v203_v37 = vadd.f32 %v202_v23, %v201_v20 }
 0x24d   :  { %1254 = vpush %v203_v37 }
 0x27e   :  { %s1255_s23 = spop %1254 }
 0x27f   :  { %s205_s30 = ssub.f32 0.0, %s1255_s23 }
 0x281   :  { %v1235_v11 = vstv %s205_s30 }
 0x28a   :  { %v1214_v0 = vpop.xlane.xlu0 %1213 }
 0x28b   :  { %v1215_v39 = vrot.slane %v1214_v0, 4 }
 0x28d   :  { %v1216_v40 = vadd.f32 %v1215_v39, %v1214_v0 }
 0x28f   :  { %v1217_v43 = vrot.slane %v1216_v40, 2 }
 0x291   :  { %v1182_v57 = vpop.xlane.xlu2 %1181  ;;  %v1218_v59 = vadd.f32 %v1217_v43, %v1216_v40 }
 0x292   :  { %v1183_v6 = vrot.slane %v1182_v57, 4 }
 0x293   :  { %v1219_v52 = vrot.slane %v1218_v59, 1 }
 0x294   :  { %v1184_v15 = vadd.f32 %v1183_v6, %v1182_v57 }
 0x295   :  { %v1220_v58 = vadd.f32 %v1219_v52, %v1218_v59 }
 0x296   :  { %v1185_v12 = vrot.slane %v1184_v15, 2 }
 0x298   :  { %v1186_v29 = vadd.f32 %v1185_v12, %v1184_v15 }
 0x29a   :  { %v1187_v3 = vrot.slane %v1186_v29, 1 }
 0x29c   :  { %v1188_v1 = vadd.f32 %v1187_v3, %v1186_v29 }
 0x29e   :  { %1256 = vpush %v1188_v1 }
 0x2bb   :  { %v1196_v45 = vpop.xlane.xlu2 %1195 }
 0x2bc   :  { %v1197_v53 = vrot.slane %v1196_v45, 4 }
 0x2be   :  { %v1198_v54 = vadd.f32 %v1197_v53, %v1196_v45 }
 0x2c0   :  { %v1199_v60 = vrot.slane %v1198_v54, 2 }
 0x2c2   :  { %v1200_v42 = vadd.f32 %v1199_v60, %v1198_v54 }
 0x2c4   :  { %v1201_v50 = vrot.slane %v1200_v42, 1 }
 0x2c6   :  { %v1202_v56 = vadd.f32 %v1201_v50, %v1200_v42 }
 0x2c8   :  { %1258 = vpush %v1202_v56 }
 0x2c9   :  { %1260 = vpush %v1220_v58 }
 0x2cf   :  { %s1257_s24 = spop %1256 }
 0x2d0   :  { %s1190_s25 = ssub.f32 0.0, %s1257_s24 }
 0x2d2   :  { %v1233_v38 = vstv %s1190_s25 }
 0x2f9   :  { %s1259_s26 = spop %1258 }
 0x2fa   :  { %s1204_s27 = ssub.f32 0.0, %s1259_s26  ;;  %s1261_s28 = spop %1260 }
 0x2fb   :  { %s1222_s29 = ssub.f32 0.0, %s1261_s28 }
 0x2fc   :  { %v1231_v55 = vstv %s1204_s27 }
 0x2fd   :  { %v1229_v48 = vstv %s1222_s29 }
 0x2fe   :  { %v1230_v63 = vsel %vm1228_vm3, %v1229_v48, 0.0 }
 0x2ff   :  { %v1232_v19 = vsel %vm1227_vm4, %v1231_v55, %v1230_v63 }
 0x300   :  { %v1234_v24 = vsel %vm1226_vm5, %v1233_v38, %v1232_v19 }
 0x301   :  { %v1236_v14 = vsel %vm1225_vm6, %v1235_v11, %v1234_v24 }
 0x302   :  { %1237 = vst [vmem:[#allocation2] sm:$0xff] %v1236_v14 }
 0x303   :  { %1248 = dma.vmem_to_hbm [thread:$0]  %s1244_s5, 128, %s1246_s8, [#allocation3]  }
 0x304   :  { %1433 = dma.done.wait [#allocation3], 128  }
 0x305   :  { %1434 = vsyncadd [#allocation3], 4294967168 }
 0x306   :  { %1253 = vsyncpa [#allocation3], 1 }

</bundles_post_ra>
